<compile_context>
chip_gen: v7x
topology: tpu7x:2x2x1
jax: 0.10.0
libtpu: 0.0.40
codegen_flags: <defaults>
</compile_context>

<pallas_src>
import functools
import jax
import jax.numpy as jnp
from jax.experimental import pallas as pl
from jax.experimental.pallas import tpu as pltpu

# ---------------- small BERT-like config ----------------
VOCAB = 128
HIDDEN = 32
N_LAYERS = 2
N_HEADS = 2
HEAD_DIM = HIDDEN // N_HEADS
INTERMEDIATE = 64
MAX_POS = 32
TYPE_VOCAB = 2
NUM_LABELS = 12          # len(tokenize_type)
LPAD = 128               # lane-dense padding for classifier / logits
LN_EPS = 1e-12
BATCH = 2
SEQ = 8


# ---------------- in-kernel helpers (operate on values, not refs) ----------------
def _layernorm(x, gamma, beta, eps=LN_EPS):
    mu = jnp.mean(x, axis=-1, keepdims=True)
    xc = x - mu
    var = jnp.mean(xc * xc, axis=-1, keepdims=True)
    inv = jax.lax.rsqrt(var + eps)
    return xc * inv * gamma + beta


def _gelu(x):
    # TODO(synk): HF BERT uses exact erf-GELU; tanh approximation used here.
    c = jnp.float32(0.7978845608028654)
    return 0.5 * x * (1.0 + jnp.tanh(c * (x + 0.044715 * x * x * x)))


# ---------------- single fused forward kernel ----------------
def _bert_fused_kernel(
    ids_ref, mask_ref, labels_ref,
    emb_slab_ref, qkv_w_ref, ao_w_ref, i_w_ref, o_w_ref, small_ref, cls_ref,
    loss_ref, logits_ref,
    ctx_ref,
    *, batch, seq, n_layers, n_heads, head_dim, inter, num_labels, vocab,
):
    H = n_heads * head_dim
    M = batch * seq
    scale = jnp.float32(1.0 / float(head_dim) ** 0.5)

    # ---- in-kernel embedding lookup: one-hot gather on the MXU ----
    ids = ids_ref[...]                                             # [M, 1] int32
    vocab_iota = jax.lax.broadcasted_iota(jnp.int32, (M, vocab), 1)
    onehot = (vocab_iota == ids).astype(jnp.float32)               # [M, VOCAB]
    word = jnp.dot(onehot, emb_slab_ref[0:vocab, :],
                   preferred_element_type=jnp.float32)             # [M, H]
    emb = word + emb_slab_ref[vocab:vocab + M, :]                  # + (pos + type0)
    ln_e = emb_slab_ref[vocab + M:vocab + M + 2, :]                # [2, H]
    x = _layernorm(emb, ln_e[0:1, :], ln_e[1:2, :])

    # additive attention-mask bias computed in-kernel from raw [B, S] mask
    bias = (1.0 - mask_ref[...]) * jnp.float32(-1e9)               # [B, S]

    for l in range(n_layers):
        sl = small_ref[l]                                          # [8, 3H]
        qkv_b = sl[0:1, :]
        ao_b = sl[1:2, 0:H]
        i_b = sl[2:3, 0:inter]
        o_b = sl[3:4, 0:H]
        ln1_g, ln1_b = sl[4:5, 0:H], sl[5:6, 0:H]
        ln2_g, ln2_b = sl[6:7, 0:H], sl[7:8, 0:H]

        # ---- fused QKV projection: one (M, H) x (H, 3H) matmul ----
        qkv = jnp.dot(x, qkv_w_ref[l], preferred_element_type=jnp.float32) + qkv_b

        # ---- attention per (batch, head); heads stored in-place (no concats) ----
        for b in range(batch):
            r0 = b * seq
            bias_b = bias[b:b + 1, :]                              # [1, S]
            qb = qkv[r0:r0 + seq, 0:H]                             # hoisted per-batch
            kb = qkv[r0:r0 + seq, H:2 * H]
            vb = qkv[r0:r0 + seq, 2 * H:3 * H]
            for h in range(n_heads):
                c0 = h * head_dim
                qh = qb[:, c0:c0 + head_dim]
                kh = kb[:, c0:c0 + head_dim]
                vh = vb[:, c0:c0 + head_dim]
                s = jax.lax.dot_general(qh, kh, (((1,), (1,)), ((), ())),
                                        preferred_element_type=jnp.float32) * scale
                s = s + bias_b                                     # [S, S]
                m = jnp.max(s, axis=-1, keepdims=True)
                p = jnp.exp(s - m)
                p = p * pl.reciprocal(jnp.sum(p, axis=-1, keepdims=True), approx=True)
                ctx_ref[r0:r0 + seq, c0:c0 + head_dim] = jnp.dot(
                    p, vh, preferred_element_type=jnp.float32)

        ctx = ctx_ref[...]                                         # [M, H]

        # ---- attention output projection + residual + LN ----
        attn_out = jnp.dot(ctx, ao_w_ref[l], preferred_element_type=jnp.float32) + ao_b
        x = _layernorm(attn_out + x, ln1_g, ln1_b)

        # ---- FFN + residual + LN ----
        hmid = _gelu(jnp.dot(x, i_w_ref[l], preferred_element_type=jnp.float32) + i_b)
        ff = jnp.dot(hmid, o_w_ref[l], preferred_element_type=jnp.float32) + o_b
        x = _layernorm(ff + x, ln2_g, ln2_b)
        # TODO(synk): dropout layers are identity (inference semantics).

    # ---- classifier (lane-padded to 128) stored directly as (B, S, LPAD) ----
    logits = jnp.dot(x, cls_ref[0:H, :], preferred_element_type=jnp.float32) \
        + cls_ref[H:H + 1, :]                                      # [M, LPAD]
    for b in range(batch):
        logits_ref[b] = logits[b * seq:(b + 1) * seq, :]

    # ---- fused cross-entropy loss (ignore_index = -100) ----
    labels = labels_ref[...]                                       # [M, 1] int32
    lane = jax.lax.broadcasted_iota(jnp.int32, logits.shape, 1)
    in_vocab = lane < num_labels
    masked = jnp.where(in_vocab, logits, jnp.float32(-1e30))
    m = jnp.max(masked, axis=-1, keepdims=True)
    lse = jnp.log(jnp.sum(jnp.exp(masked - m), axis=-1, keepdims=True)) + m
    picked = jnp.sum(jnp.where(lane == labels, logits, 0.0), axis=-1, keepdims=True)
    valid = (labels != -100).astype(jnp.float32)
    nll = (lse - picked) * valid
    total = jnp.sum(nll, axis=(0, 1), keepdims=True)
    cnt = jnp.maximum(jnp.sum(valid, axis=(0, 1), keepdims=True), 1.0)
    loss_ref[...] = total / cnt


# ---------------- parameter init (deterministic, synthetic) ----------------
def init_params(key):
    def nrm(k, shape):
        return (jax.random.normal(k, shape, jnp.float32) * 0.02).astype(jnp.float32)

    keys = iter(jax.random.split(key, 8 + N_LAYERS * 16))
    params = {
        "word_emb": nrm(next(keys), (VOCAB, HIDDEN)),
        "pos_emb": nrm(next(keys), (MAX_POS, HIDDEN)),
        "type_emb": nrm(next(keys), (TYPE_VOCAB, HIDDEN)),
        "emb_ln_g": jnp.ones((HIDDEN,), jnp.float32),
        "emb_ln_b": jnp.zeros((HIDDEN,), jnp.float32),
        "cls_w": nrm(next(keys), (HIDDEN, NUM_LABELS)),
        "cls_b": jnp.zeros((NUM_LABELS,), jnp.float32),
        "layers": [],
    }
    for _ in range(N_LAYERS):
        layer = {
            "q_w": nrm(next(keys), (HIDDEN, HIDDEN)), "q_b": jnp.zeros((HIDDEN,), jnp.float32),
            "k_w": nrm(next(keys), (HIDDEN, HIDDEN)), "k_b": jnp.zeros((HIDDEN,), jnp.float32),
            "v_w": nrm(next(keys), (HIDDEN, HIDDEN)), "v_b": jnp.zeros((HIDDEN,), jnp.float32),
            "ao_w": nrm(next(keys), (HIDDEN, HIDDEN)), "ao_b": jnp.zeros((HIDDEN,), jnp.float32),
            "attn_ln_g": jnp.ones((HIDDEN,), jnp.float32),
            "attn_ln_b": jnp.zeros((HIDDEN,), jnp.float32),
            "i_w": nrm(next(keys), (HIDDEN, INTERMEDIATE)), "i_b": jnp.zeros((INTERMEDIATE,), jnp.float32),
            "o_w": nrm(next(keys), (INTERMEDIATE, HIDDEN)), "o_b": jnp.zeros((HIDDEN,), jnp.float32),
            "ffn_ln_g": jnp.ones((HIDDEN,), jnp.float32),
            "ffn_ln_b": jnp.zeros((HIDDEN,), jnp.float32),
        }
        params["layers"].append(layer)
    return params


# ---------------- one-time parameter packing (hoisted out of the call path) ----------------
def prepare_params(params, batch=BATCH, seq=SEQ):
    H, I, W3 = HIDDEN, INTERMEDIATE, 3 * HIDDEN
    M = batch * seq

    # embedding slab: [VOCAB] word rows | [M] (pos + type0) rows | emb-LN gamma/beta
    # TODO(synk): token_type_ids hardcoded to segment 0 (as in original usage).
    pos_type = params["pos_emb"][:seq] + params["type_emb"][0][None, :]     # [S, H]
    emb_slab = jnp.concatenate(
        [params["word_emb"],
         jnp.tile(pos_type, (batch, 1)),
         params["emb_ln_g"][None, :],
         params["emb_ln_b"][None, :]], axis=0)                              # [VOCAB+M+2, H]

    def stack(fn):
        return jnp.stack([fn(l) for l in params["layers"]])

    qkv_w = stack(lambda l: jnp.concatenate([l["q_w"], l["k_w"], l["v_w"]], axis=1))
    ao_w = stack(lambda l: l["ao_w"])
    i_w = stack(lambda l: l["i_w"])
    o_w = stack(lambda l: l["o_w"])

    def pad_row(v, width=W3):
        return jnp.zeros((width,), jnp.float32).at[:v.shape[0]].set(v)

    # per-layer tiny params: 8 rows of width 3H
    small = stack(lambda l: jnp.stack([
        jnp.concatenate([l["q_b"], l["k_b"], l["v_b"]]),
        pad_row(l["ao_b"]), pad_row(l["i_b"]), pad_row(l["o_b"]),
        pad_row(l["attn_ln_g"]), pad_row(l["attn_ln_b"]),
        pad_row(l["ffn_ln_g"]), pad_row(l["ffn_ln_b"]),
    ]))                                                                     # [L, 8, 3H]

    # classifier slab, lane-padded to 128: rows 0..H-1 weight, row H bias
    cls_slab = jnp.zeros((H + 1, LPAD), jnp.float32)
    cls_slab = cls_slab.at[:H, :NUM_LABELS].set(params["cls_w"])
    cls_slab = cls_slab.at[H, :NUM_LABELS].set(params["cls_b"])

    return {"emb_slab": emb_slab, "qkv_w": qkv_w, "ao_w": ao_w, "i_w": i_w,
            "o_w": o_w, "small": small, "cls_slab": cls_slab}


# ---------------- BERT forward (loss, logits) ----------------
def bert_forward(packed, input_ids, attention_mask, labels):
    B, S = input_ids.shape
    M = B * S

    # only per-call glue: tiny reshapes/casts of the dynamic inputs
    ids_col = input_ids.reshape(M, 1).astype(jnp.int32)
    labels_col = labels.reshape(M, 1).astype(jnp.int32)
    mask_f = attention_mask.astype(jnp.float32)

    def full(shape):
        return pl.BlockSpec(shape, lambda i, _s=len(shape): (0,) * _s)

    kernel = functools.partial(
        _bert_fused_kernel, batch=B, seq=S, n_layers=N_LAYERS,
        n_heads=N_HEADS, head_dim=HEAD_DIM, inter=INTERMEDIATE,
        num_labels=NUM_LABELS, vocab=VOCAB)

    loss, logits_pad = pl.pallas_call(
        kernel,
        out_shape=(jax.ShapeDtypeStruct((1, 1), jnp.float32),
                   jax.ShapeDtypeStruct((B, S, LPAD), jnp.float32)),
        grid=(1,),
        in_specs=[
            full((M, 1)),                            # input ids
            full((B, S)),                            # attention mask
            full((M, 1)),                            # labels
            full(packed["emb_slab"].shape),          # word emb | pos+type | emb LN
            full(packed["qkv_w"].shape),             # fused QKV weight
            full(packed["ao_w"].shape),              # attn out weight
            full(packed["i_w"].shape),               # ffn in weight
            full(packed["o_w"].shape),               # ffn out weight
            full(packed["small"].shape),             # biases + LN params slab
            full(packed["cls_slab"].shape),          # classifier weight+bias (padded)
        ],
        out_specs=(full((1, 1)), full((B, S, LPAD))),
        scratch_shapes=[pltpu.VMEM((M, HIDDEN), jnp.float32)],   # attention ctx
        compiler_params=pltpu.CompilerParams(dimension_semantics=("arbitrary",)),
    )(ids_col, mask_f, labels_col,
      packed["emb_slab"], packed["qkv_w"], packed["ao_w"], packed["i_w"],
      packed["o_w"], packed["small"], packed["cls_slab"])

    # matches HF `return_dict=False` with labels: (loss, logits)
    return loss[0, 0], logits_pad[:, :, :NUM_LABELS]


if __name__ == "__main__":
    root = jax.random.PRNGKey(0)
    k_params, k_ids, k_labels = jax.random.split(root, 3)

    params = init_params(k_params)
    packed = prepare_params(params, BATCH, SEQ)     # one-time packing (not per call)

    input_id = jax.random.randint(k_ids, (BATCH, SEQ), 0, VOCAB, dtype=jnp.int32)
    mask = jnp.ones((BATCH, SEQ), jnp.int32).at[1, SEQ - 2:].set(0)   # pad tail of batch 1
    label = jax.random.randint(k_labels, (BATCH, SEQ), 0, NUM_LABELS, dtype=jnp.int32)

    loss, logits = jax.jit(bert_forward)(packed, input_id, mask, label)
    jax.block_until_ready((loss, logits))
    assert logits.shape == (BATCH, SEQ, NUM_LABELS)
    assert jnp.isfinite(loss)
    print("KERNEL_OK")
</pallas_src>

<mosaic_0001>
module attributes {stable_mosaic.version = 11 : i64} {
  func.func @_bert_fused_kernel(%arg0: i32, %arg1: memref<16x1xi32, #tpu.memory_space<vmem>>, %arg2: memref<2x8xf32, #tpu.memory_space<vmem>>, %arg3: memref<16x1xi32, #tpu.memory_space<vmem>>, %arg4: memref<146x32xf32, #tpu.memory_space<vmem>>, %arg5: memref<2x32x96xf32, #tpu.memory_space<vmem>>, %arg6: memref<2x32x32xf32, #tpu.memory_space<vmem>>, %arg7: memref<2x32x64xf32, #tpu.memory_space<vmem>>, %arg8: memref<2x64x32xf32, #tpu.memory_space<vmem>>, %arg9: memref<2x8x96xf32, #tpu.memory_space<vmem>>, %arg10: memref<33x128xf32, #tpu.memory_space<vmem>>, %arg11: memref<1x1xf32, #tpu.memory_space<vmem>>, %arg12: memref<2x8x128xf32, #tpu.memory_space<vmem>>, %arg13: memref<16x32xf32, #tpu.memory_space<vmem>>) attributes {dimension_semantics = [#tpu.dimension_semantics<arbitrary>], iteration_bounds = array<i64: 1>, scalar_prefetch = 0 : i64, scratch_operands = 1 : i64, tpu.core_type = #tpu.core_type<tc>, window_params = [{pipeline_mode = #tpu.pipeline_mode<synchronous>, transform_indices = @transform_0, window_bounds = array<i64: 16, 1>}, {pipeline_mode = #tpu.pipeline_mode<synchronous>, transform_indices = @transform_1, window_bounds = array<i64: 2, 8>}, {pipeline_mode = #tpu.pipeline_mode<synchronous>, transform_indices = @transform_2, window_bounds = array<i64: 16, 1>}, {pipeline_mode = #tpu.pipeline_mode<synchronous>, transform_indices = @transform_3, window_bounds = array<i64: 146, 32>}, {pipeline_mode = #tpu.pipeline_mode<synchronous>, transform_indices = @transform_4, window_bounds = array<i64: 2, 32, 96>}, {pipeline_mode = #tpu.pipeline_mode<synchronous>, transform_indices = @transform_5, window_bounds = array<i64: 2, 32, 32>}, {pipeline_mode = #tpu.pipeline_mode<synchronous>, transform_indices = @transform_6, window_bounds = array<i64: 2, 32, 64>}, {pipeline_mode = #tpu.pipeline_mode<synchronous>, transform_indices = @transform_7, window_bounds = array<i64: 2, 64, 32>}, {pipeline_mode = #tpu.pipeline_mode<synchronous>, transform_indices = @transform_8, window_bounds = array<i64: 2, 8, 96>}, {pipeline_mode = #tpu.pipeline_mode<synchronous>, transform_indices = @transform_9, window_bounds = array<i64: 33, 128>}, {pipeline_mode = #tpu.pipeline_mode<synchronous>, transform_indices = @transform_10, window_bounds = array<i64: 1, 1>}, {pipeline_mode = #tpu.pipeline_mode<synchronous>, transform_indices = @transform_11, window_bounds = array<i64: 2, 8, 128>}]} {
    %c0 = arith.constant 0 : index
    %c0_0 = arith.constant 0 : index
    %0 = vector.load %arg1[%c0, %c0_0] : memref<16x1xi32, #tpu.memory_space<vmem>>, vector<16x1xi32>
    %1 = tpu.iota {dimensions = array<i32: 1>} : vector<16x128xi32>
    %2 = vector.broadcast %0 : vector<16x1xi32> to vector<16x128xi32>
    %3 = arith.cmpi eq, %1, %2 : vector<16x128xi32>
    %4 = arith.extui %3 : vector<16x128xi1> to vector<16x128xi32>
    %5 = arith.sitofp %4 : vector<16x128xi32> to vector<16x128xf32>
    %c0_1 = arith.constant 0 : index
    %c0_2 = arith.constant 0 : index
    %6 = vector.load %arg4[%c0_1, %c0_2] : memref<146x32xf32, #tpu.memory_space<vmem>>, vector<128x32xf32>
    %cst = arith.constant dense<0.000000e+00> : vector<16x32xf32>
    %7 = tpu.matmul %5, %6, %cst {dimension_numbers = #tpu.dot_dimension_numbers<[1], [0], [0], [1], [0, 0, 1, 1], [], []>} : vector<16x128xf32>, vector<128x32xf32>, vector<16x32xf32> -> vector<16x32xf32>
    %c128 = arith.constant 128 : index
    %c0_3 = arith.constant 0 : index
    %8 = vector.load %arg4[%c128, %c0_3] : memref<146x32xf32, #tpu.memory_space<vmem>>, vector<16x32xf32>
    %9 = arith.addf %7, %8 : vector<16x32xf32>
    %c144 = arith.constant 144 : index
    %c0_4 = arith.constant 0 : index
    %10 = vector.load %arg4[%c144, %c0_4] : memref<146x32xf32, #tpu.memory_space<vmem>>, vector<2x32xf32>
    %11 = vector.extract_strided_slice %10 {offsets = [0, 0], sizes = [1, 32], strides = [1, 1]} : vector<2x32xf32> to vector<1x32xf32>
    %12 = vector.extract_strided_slice %10 {offsets = [1, 0], sizes = [1, 32], strides = [1, 1]} : vector<2x32xf32> to vector<1x32xf32>
    %cst_5 = arith.constant dense<0.000000e+00> : vector<16xf32>
    %13 = vector.multi_reduction <add>, %9, %cst_5 [1] : vector<16x32xf32> to vector<16xf32>
    %14 = vector.shape_cast %13 : vector<16xf32> to vector<16x1xf32>
    %cst_6 = arith.constant 3.200000e+01 : f32
    %15 = vector.broadcast %cst_6 : f32 to vector<16x1xf32>
    %16 = arith.divf %14, %15 : vector<16x1xf32>
    %17 = vector.broadcast %16 : vector<16x1xf32> to vector<16x32xf32>
    %18 = arith.subf %9, %17 : vector<16x32xf32>
    %19 = arith.mulf %18, %18 : vector<16x32xf32>
    %cst_7 = arith.constant dense<0.000000e+00> : vector<16xf32>
    %20 = vector.multi_reduction <add>, %19, %cst_7 [1] : vector<16x32xf32> to vector<16xf32>
    %21 = vector.shape_cast %20 : vector<16xf32> to vector<16x1xf32>
    %cst_8 = arith.constant 3.200000e+01 : f32
    %22 = vector.broadcast %cst_8 : f32 to vector<16x1xf32>
    %23 = arith.divf %21, %22 : vector<16x1xf32>
    %cst_9 = arith.constant 9.99999996E-13 : f32
    %24 = vector.broadcast %cst_9 : f32 to vector<16x1xf32>
    %25 = arith.addf %23, %24 : vector<16x1xf32>
    %26 = math.rsqrt %25 : vector<16x1xf32>
    %27 = vector.broadcast %26 : vector<16x1xf32> to vector<16x32xf32>
    %28 = arith.mulf %18, %27 : vector<16x32xf32>
    %29 = vector.broadcast %11 : vector<1x32xf32> to vector<16x32xf32>
    %30 = arith.mulf %28, %29 : vector<16x32xf32>
    %31 = vector.broadcast %12 : vector<1x32xf32> to vector<16x32xf32>
    %32 = arith.addf %30, %31 : vector<16x32xf32>
    %c0_10 = arith.constant 0 : index
    %c0_11 = arith.constant 0 : index
    %33 = vector.load %arg2[%c0_10, %c0_11] : memref<2x8xf32, #tpu.memory_space<vmem>>, vector<2x8xf32>
    %cst_12 = arith.constant 1.000000e+00 : f32
    %34 = vector.broadcast %cst_12 : f32 to vector<2x8xf32>
    %35 = arith.subf %34, %33 : vector<2x8xf32>
    %cst_13 = arith.constant -1.000000e+09 : f32
    %36 = vector.broadcast %cst_13 : f32 to vector<2x8xf32>
    %37 = arith.mulf %35, %36 : vector<2x8xf32>
    %c0_14 = arith.constant 0 : index
    %c0_15 = arith.constant 0 : index
    %c0_16 = arith.constant 0 : index
    %38 = vector.load %arg9[%c0_14, %c0_15, %c0_16] : memref<2x8x96xf32, #tpu.memory_space<vmem>>, vector<1x8x96xf32>
    %39 = vector.shape_cast %38 : vector<1x8x96xf32> to vector<8x96xf32>
    %40 = vector.extract_strided_slice %39 {offsets = [0, 0], sizes = [1, 96], strides = [1, 1]} : vector<8x96xf32> to vector<1x96xf32>
    %41 = vector.extract_strided_slice %39 {offsets = [1, 0], sizes = [1, 32], strides = [1, 1]} : vector<8x96xf32> to vector<1x32xf32>
    %42 = vector.extract_strided_slice %39 {offsets = [2, 0], sizes = [1, 64], strides = [1, 1]} : vector<8x96xf32> to vector<1x64xf32>
    %43 = vector.extract_strided_slice %39 {offsets = [3, 0], sizes = [1, 32], strides = [1, 1]} : vector<8x96xf32> to vector<1x32xf32>
    %44 = vector.extract_strided_slice %39 {offsets = [4, 0], sizes = [1, 32], strides = [1, 1]} : vector<8x96xf32> to vector<1x32xf32>
    %45 = vector.extract_strided_slice %39 {offsets = [5, 0], sizes = [1, 32], strides = [1, 1]} : vector<8x96xf32> to vector<1x32xf32>
    %46 = vector.extract_strided_slice %39 {offsets = [6, 0], sizes = [1, 32], strides = [1, 1]} : vector<8x96xf32> to vector<1x32xf32>
    %47 = vector.extract_strided_slice %39 {offsets = [7, 0], sizes = [1, 32], strides = [1, 1]} : vector<8x96xf32> to vector<1x32xf32>
    %c0_17 = arith.constant 0 : index
    %c0_18 = arith.constant 0 : index
    %c0_19 = arith.constant 0 : index
    %48 = vector.load %arg5[%c0_17, %c0_18, %c0_19] : memref<2x32x96xf32, #tpu.memory_space<vmem>>, vector<1x32x96xf32>
    %49 = vector.shape_cast %48 : vector<1x32x96xf32> to vector<32x96xf32>
    %cst_20 = arith.constant dense<0.000000e+00> : vector<16x96xf32>
    %50 = tpu.matmul %32, %49, %cst_20 {dimension_numbers = #tpu.dot_dimension_numbers<[1], [0], [0], [1], [0, 0, 1, 1], [], []>} : vector<16x32xf32>, vector<32x96xf32>, vector<16x96xf32> -> vector<16x96xf32>
    %51 = vector.broadcast %40 : vector<1x96xf32> to vector<16x96xf32>
    %52 = arith.addf %50, %51 : vector<16x96xf32>
    %53 = vector.extract_strided_slice %37 {offsets = [0, 0], sizes = [1, 8], strides = [1, 1]} : vector<2x8xf32> to vector<1x8xf32>
    %54 = vector.extract_strided_slice %52 {offsets = [0, 0], sizes = [8, 32], strides = [1, 1]} : vector<16x96xf32> to vector<8x32xf32>
    %55 = vector.extract_strided_slice %52 {offsets = [0, 32], sizes = [8, 32], strides = [1, 1]} : vector<16x96xf32> to vector<8x32xf32>
    %56 = vector.extract_strided_slice %52 {offsets = [0, 64], sizes = [8, 32], strides = [1, 1]} : vector<16x96xf32> to vector<8x32xf32>
    %57 = vector.extract_strided_slice %54 {offsets = [0, 0], sizes = [8, 16], strides = [1, 1]} : vector<8x32xf32> to vector<8x16xf32>
    %58 = vector.extract_strided_slice %55 {offsets = [0, 0], sizes = [8, 16], strides = [1, 1]} : vector<8x32xf32> to vector<8x16xf32>
    %59 = vector.extract_strided_slice %56 {offsets = [0, 0], sizes = [8, 16], strides = [1, 1]} : vector<8x32xf32> to vector<8x16xf32>
    %cst_21 = arith.constant dense<0.000000e+00> : vector<8x8xf32>
    %60 = tpu.matmul %57, %58, %cst_21 {dimension_numbers = #tpu.dot_dimension_numbers<[1], [1], [0], [0], [0, 0, 1, 0], [], []>} : vector<8x16xf32>, vector<8x16xf32>, vector<8x8xf32> -> vector<8x8xf32>
    %cst_22 = arith.constant 2.500000e-01 : f32
    %61 = vector.broadcast %cst_22 : f32 to vector<8x8xf32>
    %62 = arith.mulf %60, %61 : vector<8x8xf32>
    %63 = vector.broadcast %53 : vector<1x8xf32> to vector<8x8xf32>
    %64 = arith.addf %62, %63 : vector<8x8xf32>
    %cst_23 = arith.constant dense<0xFF800000> : vector<8xf32>
    %65 = vector.multi_reduction <maximumf>, %64, %cst_23 [1] : vector<8x8xf32> to vector<8xf32>
    %66 = vector.shape_cast %65 : vector<8xf32> to vector<8x1xf32>
    %67 = vector.broadcast %66 : vector<8x1xf32> to vector<8x8xf32>
    %68 = arith.subf %64, %67 : vector<8x8xf32>
    %69 = math.exp %68 : vector<8x8xf32>
    %cst_24 = arith.constant dense<0.000000e+00> : vector<8xf32>
    %70 = vector.multi_reduction <add>, %69, %cst_24 [1] : vector<8x8xf32> to vector<8xf32>
    %71 = vector.shape_cast %70 : vector<8xf32> to vector<8x1xf32>
    %72 = tpu.reciprocal %71 {approx = true} : vector<8x1xf32> -> vector<8x1xf32>
    %73 = vector.broadcast %72 : vector<8x1xf32> to vector<8x8xf32>
    %74 = arith.mulf %69, %73 : vector<8x8xf32>
    %cst_25 = arith.constant dense<0.000000e+00> : vector<8x16xf32>
    %75 = tpu.matmul %74, %59, %cst_25 {dimension_numbers = #tpu.dot_dimension_numbers<[1], [0], [0], [1], [0, 0, 1, 1], [], []>} : vector<8x8xf32>, vector<8x16xf32>, vector<8x16xf32> -> vector<8x16xf32>
    %c0_26 = arith.constant 0 : index
    %c0_27 = arith.constant 0 : index
    %76 = vector.load %arg13[%c0_26, %c0_27] : memref<16x32xf32, #tpu.memory_space<vmem>>, vector<8x16xf32>
    tpu.vector_store %arg13[%c0_26, %c0_27], %75 {strides = array<i32>} : memref<16x32xf32, #tpu.memory_space<vmem>>, vector<8x16xf32>,
    %77 = vector.extract_strided_slice %54 {offsets = [0, 16], sizes = [8, 16], strides = [1, 1]} : vector<8x32xf32> to vector<8x16xf32>
    %78 = vector.extract_strided_slice %55 {offsets = [0, 16], sizes = [8, 16], strides = [1, 1]} : vector<8x32xf32> to vector<8x16xf32>
    %79 = vector.extract_strided_slice %56 {offsets = [0, 16], sizes = [8, 16], strides = [1, 1]} : vector<8x32xf32> to vector<8x16xf32>
    %cst_28 = arith.constant dense<0.000000e+00> : vector<8x8xf32>
    %80 = tpu.matmul %77, %78, %cst_28 {dimension_numbers = #tpu.dot_dimension_numbers<[1], [1], [0], [0], [0, 0, 1, 0], [], []>} : vector<8x16xf32>, vector<8x16xf32>, vector<8x8xf32> -> vector<8x8xf32>
    %cst_29 = arith.constant 2.500000e-01 : f32
    %81 = vector.broadcast %cst_29 : f32 to vector<8x8xf32>
    %82 = arith.mulf %80, %81 : vector<8x8xf32>
    %83 = vector.broadcast %53 : vector<1x8xf32> to vector<8x8xf32>
    %84 = arith.addf %82, %83 : vector<8x8xf32>
    %cst_30 = arith.constant dense<0xFF800000> : vector<8xf32>
    %85 = vector.multi_reduction <maximumf>, %84, %cst_30 [1] : vector<8x8xf32> to vector<8xf32>
    %86 = vector.shape_cast %85 : vector<8xf32> to vector<8x1xf32>
    %87 = vector.broadcast %86 : vector<8x1xf32> to vector<8x8xf32>
    %88 = arith.subf %84, %87 : vector<8x8xf32>
    %89 = math.exp %88 : vector<8x8xf32>
    %cst_31 = arith.constant dense<0.000000e+00> : vector<8xf32>
    %90 = vector.multi_reduction <add>, %89, %cst_31 [1] : vector<8x8xf32> to vector<8xf32>
    %91 = vector.shape_cast %90 : vector<8xf32> to vector<8x1xf32>
    %92 = tpu.reciprocal %91 {approx = true} : vector<8x1xf32> -> vector<8x1xf32>
    %93 = vector.broadcast %92 : vector<8x1xf32> to vector<8x8xf32>
    %94 = arith.mulf %89, %93 : vector<8x8xf32>
    %cst_32 = arith.constant dense<0.000000e+00> : vector<8x16xf32>
    %95 = tpu.matmul %94, %79, %cst_32 {dimension_numbers = #tpu.dot_dimension_numbers<[1], [0], [0], [1], [0, 0, 1, 1], [], []>} : vector<8x8xf32>, vector<8x16xf32>, vector<8x16xf32> -> vector<8x16xf32>
    %c0_33 = arith.constant 0 : index
    %c16 = arith.constant 16 : index
    %96 = vector.load %arg13[%c0_33, %c16] : memref<16x32xf32, #tpu.memory_space<vmem>>, vector<8x16xf32>
    tpu.vector_store %arg13[%c0_33, %c16], %95 {strides = array<i32>} : memref<16x32xf32, #tpu.memory_space<vmem>>, vector<8x16xf32>,
    %97 = vector.extract_strided_slice %37 {offsets = [1, 0], sizes = [1, 8], strides = [1, 1]} : vector<2x8xf32> to vector<1x8xf32>
    %98 = vector.extract_strided_slice %52 {offsets = [8, 0], sizes = [8, 32], strides = [1, 1]} : vector<16x96xf32> to vector<8x32xf32>
    %99 = vector.extract_strided_slice %52 {offsets = [8, 32], sizes = [8, 32], strides = [1, 1]} : vector<16x96xf32> to vector<8x32xf32>
    %100 = vector.extract_strided_slice %52 {offsets = [8, 64], sizes = [8, 32], strides = [1, 1]} : vector<16x96xf32> to vector<8x32xf32>
    %101 = vector.extract_strided_slice %98 {offsets = [0, 0], sizes = [8, 16], strides = [1, 1]} : vector<8x32xf32> to vector<8x16xf32>
    %102 = vector.extract_strided_slice %99 {offsets = [0, 0], sizes = [8, 16], strides = [1, 1]} : vector<8x32xf32> to vector<8x16xf32>
    %103 = vector.extract_strided_slice %100 {offsets = [0, 0], sizes = [8, 16], strides = [1, 1]} : vector<8x32xf32> to vector<8x16xf32>
    %cst_34 = arith.constant dense<0.000000e+00> : vector<8x8xf32>
    %104 = tpu.matmul %101, %102, %cst_34 {dimension_numbers = #tpu.dot_dimension_numbers<[1], [1], [0], [0], [0, 0, 1, 0], [], []>} : vector<8x16xf32>, vector<8x16xf32>, vector<8x8xf32> -> vector<8x8xf32>
    %cst_35 = arith.constant 2.500000e-01 : f32
    %105 = vector.broadcast %cst_35 : f32 to vector<8x8xf32>
    %106 = arith.mulf %104, %105 : vector<8x8xf32>
    %107 = vector.broadcast %97 : vector<1x8xf32> to vector<8x8xf32>
    %108 = arith.addf %106, %107 : vector<8x8xf32>
    %cst_36 = arith.constant dense<0xFF800000> : vector<8xf32>
    %109 = vector.multi_reduction <maximumf>, %108, %cst_36 [1] : vector<8x8xf32> to vector<8xf32>
    %110 = vector.shape_cast %109 : vector<8xf32> to vector<8x1xf32>
    %111 = vector.broadcast %110 : vector<8x1xf32> to vector<8x8xf32>
    %112 = arith.subf %108, %111 : vector<8x8xf32>
    %113 = math.exp %112 : vector<8x8xf32>
    %cst_37 = arith.constant dense<0.000000e+00> : vector<8xf32>
    %114 = vector.multi_reduction <add>, %113, %cst_37 [1] : vector<8x8xf32> to vector<8xf32>
    %115 = vector.shape_cast %114 : vector<8xf32> to vector<8x1xf32>
    %116 = tpu.reciprocal %115 {approx = true} : vector<8x1xf32> -> vector<8x1xf32>
    %117 = vector.broadcast %116 : vector<8x1xf32> to vector<8x8xf32>
    %118 = arith.mulf %113, %117 : vector<8x8xf32>
    %cst_38 = arith.constant dense<0.000000e+00> : vector<8x16xf32>
    %119 = tpu.matmul %118, %103, %cst_38 {dimension_numbers = #tpu.dot_dimension_numbers<[1], [0], [0], [1], [0, 0, 1, 1], [], []>} : vector<8x8xf32>, vector<8x16xf32>, vector<8x16xf32> -> vector<8x16xf32>
    %c8 = arith.constant 8 : index
    %c0_39 = arith.constant 0 : index
    %120 = vector.load %arg13[%c8, %c0_39] : memref<16x32xf32, #tpu.memory_space<vmem>>, vector<8x16xf32>
    tpu.vector_store %arg13[%c8, %c0_39], %119 {strides = array<i32>} : memref<16x32xf32, #tpu.memory_space<vmem>>, vector<8x16xf32>,
    %121 = vector.extract_strided_slice %98 {offsets = [0, 16], sizes = [8, 16], strides = [1, 1]} : vector<8x32xf32> to vector<8x16xf32>
    %122 = vector.extract_strided_slice %99 {offsets = [0, 16], sizes = [8, 16], strides = [1, 1]} : vector<8x32xf32> to vector<8x16xf32>
    %123 = vector.extract_strided_slice %100 {offsets = [0, 16], sizes = [8, 16], strides = [1, 1]} : vector<8x32xf32> to vector<8x16xf32>
    %cst_40 = arith.constant dense<0.000000e+00> : vector<8x8xf32>
    %124 = tpu.matmul %121, %122, %cst_40 {dimension_numbers = #tpu.dot_dimension_numbers<[1], [1], [0], [0], [0, 0, 1, 0], [], []>} : vector<8x16xf32>, vector<8x16xf32>, vector<8x8xf32> -> vector<8x8xf32>
    %cst_41 = arith.constant 2.500000e-01 : f32
    %125 = vector.broadcast %cst_41 : f32 to vector<8x8xf32>
    %126 = arith.mulf %124, %125 : vector<8x8xf32>
    %127 = vector.broadcast %97 : vector<1x8xf32> to vector<8x8xf32>
    %128 = arith.addf %126, %127 : vector<8x8xf32>
    %cst_42 = arith.constant dense<0xFF800000> : vector<8xf32>
    %129 = vector.multi_reduction <maximumf>, %128, %cst_42 [1] : vector<8x8xf32> to vector<8xf32>
    %130 = vector.shape_cast %129 : vector<8xf32> to vector<8x1xf32>
    %131 = vector.broadcast %130 : vector<8x1xf32> to vector<8x8xf32>
    %132 = arith.subf %128, %131 : vector<8x8xf32>
    %133 = math.exp %132 : vector<8x8xf32>
    %cst_43 = arith.constant dense<0.000000e+00> : vector<8xf32>
    %134 = vector.multi_reduction <add>, %133, %cst_43 [1] : vector<8x8xf32> to vector<8xf32>
    %135 = vector.shape_cast %134 : vector<8xf32> to vector<8x1xf32>
    %136 = tpu.reciprocal %135 {approx = true} : vector<8x1xf32> -> vector<8x1xf32>
    %137 = vector.broadcast %136 : vector<8x1xf32> to vector<8x8xf32>
    %138 = arith.mulf %133, %137 : vector<8x8xf32>
    %cst_44 = arith.constant dense<0.000000e+00> : vector<8x16xf32>
    %139 = tpu.matmul %138, %123, %cst_44 {dimension_numbers = #tpu.dot_dimension_numbers<[1], [0], [0], [1], [0, 0, 1, 1], [], []>} : vector<8x8xf32>, vector<8x16xf32>, vector<8x16xf32> -> vector<8x16xf32>
    %c8_45 = arith.constant 8 : index
    %c16_46 = arith.constant 16 : index
    %140 = vector.load %arg13[%c8_45, %c16_46] : memref<16x32xf32, #tpu.memory_space<vmem>>, vector<8x16xf32>
    tpu.vector_store %arg13[%c8_45, %c16_46], %139 {strides = array<i32>} : memref<16x32xf32, #tpu.memory_space<vmem>>, vector<8x16xf32>,
    %c0_47 = arith.constant 0 : index
    %c0_48 = arith.constant 0 : index
    %141 = vector.load %arg13[%c0_47, %c0_48] : memref<16x32xf32, #tpu.memory_space<vmem>>, vector<16x32xf32>
    %c0_49 = arith.constant 0 : index
    %c0_50 = arith.constant 0 : index
    %c0_51 = arith.constant 0 : index
    %142 = vector.load %arg6[%c0_49, %c0_50, %c0_51] : memref<2x32x32xf32, #tpu.memory_space<vmem>>, vector<1x32x32xf32>
    %143 = vector.shape_cast %142 : vector<1x32x32xf32> to vector<32x32xf32>
    %cst_52 = arith.constant dense<0.000000e+00> : vector<16x32xf32>
    %144 = tpu.matmul %141, %143, %cst_52 {dimension_numbers = #tpu.dot_dimension_numbers<[1], [0], [0], [1], [0, 0, 1, 1], [], []>} : vector<16x32xf32>, vector<32x32xf32>, vector<16x32xf32> -> vector<16x32xf32>
    %145 = vector.broadcast %41 : vector<1x32xf32> to vector<16x32xf32>
    %146 = arith.addf %144, %145 : vector<16x32xf32>
    %147 = arith.addf %146, %32 : vector<16x32xf32>
    %cst_53 = arith.constant dense<0.000000e+00> : vector<16xf32>
    %148 = vector.multi_reduction <add>, %147, %cst_53 [1] : vector<16x32xf32> to vector<16xf32>
    %149 = vector.shape_cast %148 : vector<16xf32> to vector<16x1xf32>
    %cst_54 = arith.constant 3.200000e+01 : f32
    %150 = vector.broadcast %cst_54 : f32 to vector<16x1xf32>
    %151 = arith.divf %149, %150 : vector<16x1xf32>
    %152 = vector.broadcast %151 : vector<16x1xf32> to vector<16x32xf32>
    %153 = arith.subf %147, %152 : vector<16x32xf32>
    %154 = arith.mulf %153, %153 : vector<16x32xf32>
    %cst_55 = arith.constant dense<0.000000e+00> : vector<16xf32>
    %155 = vector.multi_reduction <add>, %154, %cst_55 [1] : vector<16x32xf32> to vector<16xf32>
    %156 = vector.shape_cast %155 : vector<16xf32> to vector<16x1xf32>
    %cst_56 = arith.constant 3.200000e+01 : f32
    %157 = vector.broadcast %cst_56 : f32 to vector<16x1xf32>
    %158 = arith.divf %156, %157 : vector<16x1xf32>
    %cst_57 = arith.constant 9.99999996E-13 : f32
    %159 = vector.broadcast %cst_57 : f32 to vector<16x1xf32>
    %160 = arith.addf %158, %159 : vector<16x1xf32>
    %161 = math.rsqrt %160 : vector<16x1xf32>
    %162 = vector.broadcast %161 : vector<16x1xf32> to vector<16x32xf32>
    %163 = arith.mulf %153, %162 : vector<16x32xf32>
    %164 = vector.broadcast %44 : vector<1x32xf32> to vector<16x32xf32>
    %165 = arith.mulf %163, %164 : vector<16x32xf32>
    %166 = vector.broadcast %45 : vector<1x32xf32> to vector<16x32xf32>
    %167 = arith.addf %165, %166 : vector<16x32xf32>
    %c0_58 = arith.constant 0 : index
    %c0_59 = arith.constant 0 : index
    %c0_60 = arith.constant 0 : index
    %168 = vector.load %arg7[%c0_58, %c0_59, %c0_60] : memref<2x32x64xf32, #tpu.memory_space<vmem>>, vector<1x32x64xf32>
    %169 = vector.shape_cast %168 : vector<1x32x64xf32> to vector<32x64xf32>
    %cst_61 = arith.constant dense<0.000000e+00> : vector<16x64xf32>
    %170 = tpu.matmul %167, %169, %cst_61 {dimension_numbers = #tpu.dot_dimension_numbers<[1], [0], [0], [1], [0, 0, 1, 1], [], []>} : vector<16x32xf32>, vector<32x64xf32>, vector<16x64xf32> -> vector<16x64xf32>
    %171 = vector.broadcast %42 : vector<1x64xf32> to vector<16x64xf32>
    %172 = arith.addf %170, %171 : vector<16x64xf32>
    %cst_62 = arith.constant 5.000000e-01 : f32
    %173 = vector.broadcast %cst_62 : f32 to vector<16x64xf32>
    %174 = arith.mulf %173, %172 : vector<16x64xf32>
    %cst_63 = arith.constant 4.471500e-02 : f32
    %175 = vector.broadcast %cst_63 : f32 to vector<16x64xf32>
    %176 = arith.mulf %175, %172 : vector<16x64xf32>
    %177 = arith.mulf %176, %172 : vector<16x64xf32>
    %178 = arith.mulf %177, %172 : vector<16x64xf32>
    %179 = arith.addf %172, %178 : vector<16x64xf32>
    %cst_64 = arith.constant 0.797884583 : f32
    %180 = vector.broadcast %cst_64 : f32 to vector<16x64xf32>
    %181 = arith.mulf %180, %179 : vector<16x64xf32>
    %182 = math.tanh %181 : vector<16x64xf32>
    %cst_65 = arith.constant 1.000000e+00 : f32
    %183 = vector.broadcast %cst_65 : f32 to vector<16x64xf32>
    %184 = arith.addf %183, %182 : vector<16x64xf32>
    %185 = arith.mulf %174, %184 : vector<16x64xf32>
    %c0_66 = arith.constant 0 : index
    %c0_67 = arith.constant 0 : index
    %c0_68 = arith.constant 0 : index
    %186 = vector.load %arg8[%c0_66, %c0_67, %c0_68] : memref<2x64x32xf32, #tpu.memory_space<vmem>>, vector<1x64x32xf32>
    %187 = vector.shape_cast %186 : vector<1x64x32xf32> to vector<64x32xf32>
    %cst_69 = arith.constant dense<0.000000e+00> : vector<16x32xf32>
    %188 = tpu.matmul %185, %187, %cst_69 {dimension_numbers = #tpu.dot_dimension_numbers<[1], [0], [0], [1], [0, 0, 1, 1], [], []>} : vector<16x64xf32>, vector<64x32xf32>, vector<16x32xf32> -> vector<16x32xf32>
    %189 = vector.broadcast %43 : vector<1x32xf32> to vector<16x32xf32>
    %190 = arith.addf %188, %189 : vector<16x32xf32>
    %191 = arith.addf %190, %167 : vector<16x32xf32>
    %cst_70 = arith.constant dense<0.000000e+00> : vector<16xf32>
    %192 = vector.multi_reduction <add>, %191, %cst_70 [1] : vector<16x32xf32> to vector<16xf32>
    %193 = vector.shape_cast %192 : vector<16xf32> to vector<16x1xf32>
    %cst_71 = arith.constant 3.200000e+01 : f32
    %194 = vector.broadcast %cst_71 : f32 to vector<16x1xf32>
    %195 = arith.divf %193, %194 : vector<16x1xf32>
    %196 = vector.broadcast %195 : vector<16x1xf32> to vector<16x32xf32>
    %197 = arith.subf %191, %196 : vector<16x32xf32>
    %198 = arith.mulf %197, %197 : vector<16x32xf32>
    %cst_72 = arith.constant dense<0.000000e+00> : vector<16xf32>
    %199 = vector.multi_reduction <add>, %198, %cst_72 [1] : vector<16x32xf32> to vector<16xf32>
    %200 = vector.shape_cast %199 : vector<16xf32> to vector<16x1xf32>
    %cst_73 = arith.constant 3.200000e+01 : f32
    %201 = vector.broadcast %cst_73 : f32 to vector<16x1xf32>
    %202 = arith.divf %200, %201 : vector<16x1xf32>
    %cst_74 = arith.constant 9.99999996E-13 : f32
    %203 = vector.broadcast %cst_74 : f32 to vector<16x1xf32>
    %204 = arith.addf %202, %203 : vector<16x1xf32>
    %205 = math.rsqrt %204 : vector<16x1xf32>
    %206 = vector.broadcast %205 : vector<16x1xf32> to vector<16x32xf32>
    %207 = arith.mulf %197, %206 : vector<16x32xf32>
    %208 = vector.broadcast %46 : vector<1x32xf32> to vector<16x32xf32>
    %209 = arith.mulf %207, %208 : vector<16x32xf32>
    %210 = vector.broadcast %47 : vector<1x32xf32> to vector<16x32xf32>
    %211 = arith.addf %209, %210 : vector<16x32xf32>
    %c1 = arith.constant 1 : index
    %c0_75 = arith.constant 0 : index
    %c0_76 = arith.constant 0 : index
    %212 = vector.load %arg9[%c1, %c0_75, %c0_76] : memref<2x8x96xf32, #tpu.memory_space<vmem>>, vector<1x8x96xf32>
    %213 = vector.shape_cast %212 : vector<1x8x96xf32> to vector<8x96xf32>
    %214 = vector.extract_strided_slice %213 {offsets = [0, 0], sizes = [1, 96], strides = [1, 1]} : vector<8x96xf32> to vector<1x96xf32>
    %215 = vector.extract_strided_slice %213 {offsets = [1, 0], sizes = [1, 32], strides = [1, 1]} : vector<8x96xf32> to vector<1x32xf32>
    %216 = vector.extract_strided_slice %213 {offsets = [2, 0], sizes = [1, 64], strides = [1, 1]} : vector<8x96xf32> to vector<1x64xf32>
    %217 = vector.extract_strided_slice %213 {offsets = [3, 0], sizes = [1, 32], strides = [1, 1]} : vector<8x96xf32> to vector<1x32xf32>
    %218 = vector.extract_strided_slice %213 {offsets = [4, 0], sizes = [1, 32], strides = [1, 1]} : vector<8x96xf32> to vector<1x32xf32>
    %219 = vector.extract_strided_slice %213 {offsets = [5, 0], sizes = [1, 32], strides = [1, 1]} : vector<8x96xf32> to vector<1x32xf32>
    %220 = vector.extract_strided_slice %213 {offsets = [6, 0], sizes = [1, 32], strides = [1, 1]} : vector<8x96xf32> to vector<1x32xf32>
    %221 = vector.extract_strided_slice %213 {offsets = [7, 0], sizes = [1, 32], strides = [1, 1]} : vector<8x96xf32> to vector<1x32xf32>
    %c1_77 = arith.constant 1 : index
    %c0_78 = arith.constant 0 : index
    %c0_79 = arith.constant 0 : index
    %222 = vector.load %arg5[%c1_77, %c0_78, %c0_79] : memref<2x32x96xf32, #tpu.memory_space<vmem>>, vector<1x32x96xf32>
    %223 = vector.shape_cast %222 : vector<1x32x96xf32> to vector<32x96xf32>
    %cst_80 = arith.constant dense<0.000000e+00> : vector<16x96xf32>
    %224 = tpu.matmul %211, %223, %cst_80 {dimension_numbers = #tpu.dot_dimension_numbers<[1], [0], [0], [1], [0, 0, 1, 1], [], []>} : vector<16x32xf32>, vector<32x96xf32>, vector<16x96xf32> -> vector<16x96xf32>
    %225 = vector.broadcast %214 : vector<1x96xf32> to vector<16x96xf32>
    %226 = arith.addf %224, %225 : vector<16x96xf32>
    %227 = vector.extract_strided_slice %37 {offsets = [0, 0], sizes = [1, 8], strides = [1, 1]} : vector<2x8xf32> to vector<1x8xf32>
    %228 = vector.extract_strided_slice %226 {offsets = [0, 0], sizes = [8, 32], strides = [1, 1]} : vector<16x96xf32> to vector<8x32xf32>
    %229 = vector.extract_strided_slice %226 {offsets = [0, 32], sizes = [8, 32], strides = [1, 1]} : vector<16x96xf32> to vector<8x32xf32>
    %230 = vector.extract_strided_slice %226 {offsets = [0, 64], sizes = [8, 32], strides = [1, 1]} : vector<16x96xf32> to vector<8x32xf32>
    %231 = vector.extract_strided_slice %228 {offsets = [0, 0], sizes = [8, 16], strides = [1, 1]} : vector<8x32xf32> to vector<8x16xf32>
    %232 = vector.extract_strided_slice %229 {offsets = [0, 0], sizes = [8, 16], strides = [1, 1]} : vector<8x32xf32> to vector<8x16xf32>
    %233 = vector.extract_strided_slice %230 {offsets = [0, 0], sizes = [8, 16], strides = [1, 1]} : vector<8x32xf32> to vector<8x16xf32>
    %cst_81 = arith.constant dense<0.000000e+00> : vector<8x8xf32>
    %234 = tpu.matmul %231, %232, %cst_81 {dimension_numbers = #tpu.dot_dimension_numbers<[1], [1], [0], [0], [0, 0, 1, 0], [], []>} : vector<8x16xf32>, vector<8x16xf32>, vector<8x8xf32> -> vector<8x8xf32>
    %cst_82 = arith.constant 2.500000e-01 : f32
    %235 = vector.broadcast %cst_82 : f32 to vector<8x8xf32>
    %236 = arith.mulf %234, %235 : vector<8x8xf32>
    %237 = vector.broadcast %227 : vector<1x8xf32> to vector<8x8xf32>
    %238 = arith.addf %236, %237 : vector<8x8xf32>
    %cst_83 = arith.constant dense<0xFF800000> : vector<8xf32>
    %239 = vector.multi_reduction <maximumf>, %238, %cst_83 [1] : vector<8x8xf32> to vector<8xf32>
    %240 = vector.shape_cast %239 : vector<8xf32> to vector<8x1xf32>
    %241 = vector.broadcast %240 : vector<8x1xf32> to vector<8x8xf32>
    %242 = arith.subf %238, %241 : vector<8x8xf32>
    %243 = math.exp %242 : vector<8x8xf32>
    %cst_84 = arith.constant dense<0.000000e+00> : vector<8xf32>
    %244 = vector.multi_reduction <add>, %243, %cst_84 [1] : vector<8x8xf32> to vector<8xf32>
    %245 = vector.shape_cast %244 : vector<8xf32> to vector<8x1xf32>
    %246 = tpu.reciprocal %245 {approx = true} : vector<8x1xf32> -> vector<8x1xf32>
    %247 = vector.broadcast %246 : vector<8x1xf32> to vector<8x8xf32>
    %248 = arith.mulf %243, %247 : vector<8x8xf32>
    %cst_85 = arith.constant dense<0.000000e+00> : vector<8x16xf32>
    %249 = tpu.matmul %248, %233, %cst_85 {dimension_numbers = #tpu.dot_dimension_numbers<[1], [0], [0], [1], [0, 0, 1, 1], [], []>} : vector<8x8xf32>, vector<8x16xf32>, vector<8x16xf32> -> vector<8x16xf32>
    %c0_86 = arith.constant 0 : index
    %c0_87 = arith.constant 0 : index
    %250 = vector.load %arg13[%c0_86, %c0_87] : memref<16x32xf32, #tpu.memory_space<vmem>>, vector<8x16xf32>
    tpu.vector_store %arg13[%c0_86, %c0_87], %249 {strides = array<i32>} : memref<16x32xf32, #tpu.memory_space<vmem>>, vector<8x16xf32>,
    %251 = vector.extract_strided_slice %228 {offsets = [0, 16], sizes = [8, 16], strides = [1, 1]} : vector<8x32xf32> to vector<8x16xf32>
    %252 = vector.extract_strided_slice %229 {offsets = [0, 16], sizes = [8, 16], strides = [1, 1]} : vector<8x32xf32> to vector<8x16xf32>
    %253 = vector.extract_strided_slice %230 {offsets = [0, 16], sizes = [8, 16], strides = [1, 1]} : vector<8x32xf32> to vector<8x16xf32>
    %cst_88 = arith.constant dense<0.000000e+00> : vector<8x8xf32>
    %254 = tpu.matmul %251, %252, %cst_88 {dimension_numbers = #tpu.dot_dimension_numbers<[1], [1], [0], [0], [0, 0, 1, 0], [], []>} : vector<8x16xf32>, vector<8x16xf32>, vector<8x8xf32> -> vector<8x8xf32>
    %cst_89 = arith.constant 2.500000e-01 : f32
    %255 = vector.broadcast %cst_89 : f32 to vector<8x8xf32>
    %256 = arith.mulf %254, %255 : vector<8x8xf32>
    %257 = vector.broadcast %227 : vector<1x8xf32> to vector<8x8xf32>
    %258 = arith.addf %256, %257 : vector<8x8xf32>
    %cst_90 = arith.constant dense<0xFF800000> : vector<8xf32>
    %259 = vector.multi_reduction <maximumf>, %258, %cst_90 [1] : vector<8x8xf32> to vector<8xf32>
    %260 = vector.shape_cast %259 : vector<8xf32> to vector<8x1xf32>
    %261 = vector.broadcast %260 : vector<8x1xf32> to vector<8x8xf32>
    %262 = arith.subf %258, %261 : vector<8x8xf32>
    %263 = math.exp %262 : vector<8x8xf32>
    %cst_91 = arith.constant dense<0.000000e+00> : vector<8xf32>
    %264 = vector.multi_reduction <add>, %263, %cst_91 [1] : vector<8x8xf32> to vector<8xf32>
    %265 = vector.shape_cast %264 : vector<8xf32> to vector<8x1xf32>
    %266 = tpu.reciprocal %265 {approx = true} : vector<8x1xf32> -> vector<8x1xf32>
    %267 = vector.broadcast %266 : vector<8x1xf32> to vector<8x8xf32>
    %268 = arith.mulf %263, %267 : vector<8x8xf32>
    %cst_92 = arith.constant dense<0.000000e+00> : vector<8x16xf32>
    %269 = tpu.matmul %268, %253, %cst_92 {dimension_numbers = #tpu.dot_dimension_numbers<[1], [0], [0], [1], [0, 0, 1, 1], [], []>} : vector<8x8xf32>, vector<8x16xf32>, vector<8x16xf32> -> vector<8x16xf32>
    %c0_93 = arith.constant 0 : index
    %c16_94 = arith.constant 16 : index
    %270 = vector.load %arg13[%c0_93, %c16_94] : memref<16x32xf32, #tpu.memory_space<vmem>>, vector<8x16xf32>
    tpu.vector_store %arg13[%c0_93, %c16_94], %269 {strides = array<i32>} : memref<16x32xf32, #tpu.memory_space<vmem>>, vector<8x16xf32>,
    %271 = vector.extract_strided_slice %37 {offsets = [1, 0], sizes = [1, 8], strides = [1, 1]} : vector<2x8xf32> to vector<1x8xf32>
    %272 = vector.extract_strided_slice %226 {offsets = [8, 0], sizes = [8, 32], strides = [1, 1]} : vector<16x96xf32> to vector<8x32xf32>
    %273 = vector.extract_strided_slice %226 {offsets = [8, 32], sizes = [8, 32], strides = [1, 1]} : vector<16x96xf32> to vector<8x32xf32>
    %274 = vector.extract_strided_slice %226 {offsets = [8, 64], sizes = [8, 32], strides = [1, 1]} : vector<16x96xf32> to vector<8x32xf32>
    %275 = vector.extract_strided_slice %272 {offsets = [0, 0], sizes = [8, 16], strides = [1, 1]} : vector<8x32xf32> to vector<8x16xf32>
    %276 = vector.extract_strided_slice %273 {offsets = [0, 0], sizes = [8, 16], strides = [1, 1]} : vector<8x32xf32> to vector<8x16xf32>
    %277 = vector.extract_strided_slice %274 {offsets = [0, 0], sizes = [8, 16], strides = [1, 1]} : vector<8x32xf32> to vector<8x16xf32>
    %cst_95 = arith.constant dense<0.000000e+00> : vector<8x8xf32>
    %278 = tpu.matmul %275, %276, %cst_95 {dimension_numbers = #tpu.dot_dimension_numbers<[1], [1], [0], [0], [0, 0, 1, 0], [], []>} : vector<8x16xf32>, vector<8x16xf32>, vector<8x8xf32> -> vector<8x8xf32>
    %cst_96 = arith.constant 2.500000e-01 : f32
    %279 = vector.broadcast %cst_96 : f32 to vector<8x8xf32>
    %280 = arith.mulf %278, %279 : vector<8x8xf32>
    %281 = vector.broadcast %271 : vector<1x8xf32> to vector<8x8xf32>
    %282 = arith.addf %280, %281 : vector<8x8xf32>
    %cst_97 = arith.constant dense<0xFF800000> : vector<8xf32>
    %283 = vector.multi_reduction <maximumf>, %282, %cst_97 [1] : vector<8x8xf32> to vector<8xf32>
    %284 = vector.shape_cast %283 : vector<8xf32> to vector<8x1xf32>
    %285 = vector.broadcast %284 : vector<8x1xf32> to vector<8x8xf32>
    %286 = arith.subf %282, %285 : vector<8x8xf32>
    %287 = math.exp %286 : vector<8x8xf32>
    %cst_98 = arith.constant dense<0.000000e+00> : vector<8xf32>
    %288 = vector.multi_reduction <add>, %287, %cst_98 [1] : vector<8x8xf32> to vector<8xf32>
    %289 = vector.shape_cast %288 : vector<8xf32> to vector<8x1xf32>
    %290 = tpu.reciprocal %289 {approx = true} : vector<8x1xf32> -> vector<8x1xf32>
    %291 = vector.broadcast %290 : vector<8x1xf32> to vector<8x8xf32>
    %292 = arith.mulf %287, %291 : vector<8x8xf32>
    %cst_99 = arith.constant dense<0.000000e+00> : vector<8x16xf32>
    %293 = tpu.matmul %292, %277, %cst_99 {dimension_numbers = #tpu.dot_dimension_numbers<[1], [0], [0], [1], [0, 0, 1, 1], [], []>} : vector<8x8xf32>, vector<8x16xf32>, vector<8x16xf32> -> vector<8x16xf32>
    %c8_100 = arith.constant 8 : index
    %c0_101 = arith.constant 0 : index
    %294 = vector.load %arg13[%c8_100, %c0_101] : memref<16x32xf32, #tpu.memory_space<vmem>>, vector<8x16xf32>
    tpu.vector_store %arg13[%c8_100, %c0_101], %293 {strides = array<i32>} : memref<16x32xf32, #tpu.memory_space<vmem>>, vector<8x16xf32>,
    %295 = vector.extract_strided_slice %272 {offsets = [0, 16], sizes = [8, 16], strides = [1, 1]} : vector<8x32xf32> to vector<8x16xf32>
    %296 = vector.extract_strided_slice %273 {offsets = [0, 16], sizes = [8, 16], strides = [1, 1]} : vector<8x32xf32> to vector<8x16xf32>
    %297 = vector.extract_strided_slice %274 {offsets = [0, 16], sizes = [8, 16], strides = [1, 1]} : vector<8x32xf32> to vector<8x16xf32>
    %cst_102 = arith.constant dense<0.000000e+00> : vector<8x8xf32>
    %298 = tpu.matmul %295, %296, %cst_102 {dimension_numbers = #tpu.dot_dimension_numbers<[1], [1], [0], [0], [0, 0, 1, 0], [], []>} : vector<8x16xf32>, vector<8x16xf32>, vector<8x8xf32> -> vector<8x8xf32>
    %cst_103 = arith.constant 2.500000e-01 : f32
    %299 = vector.broadcast %cst_103 : f32 to vector<8x8xf32>
    %300 = arith.mulf %298, %299 : vector<8x8xf32>
    %301 = vector.broadcast %271 : vector<1x8xf32> to vector<8x8xf32>
    %302 = arith.addf %300, %301 : vector<8x8xf32>
    %cst_104 = arith.constant dense<0xFF800000> : vector<8xf32>
    %303 = vector.multi_reduction <maximumf>, %302, %cst_104 [1] : vector<8x8xf32> to vector<8xf32>
    %304 = vector.shape_cast %303 : vector<8xf32> to vector<8x1xf32>
    %305 = vector.broadcast %304 : vector<8x1xf32> to vector<8x8xf32>
    %306 = arith.subf %302, %305 : vector<8x8xf32>
    %307 = math.exp %306 : vector<8x8xf32>
    %cst_105 = arith.constant dense<0.000000e+00> : vector<8xf32>
    %308 = vector.multi_reduction <add>, %307, %cst_105 [1] : vector<8x8xf32> to vector<8xf32>
    %309 = vector.shape_cast %308 : vector<8xf32> to vector<8x1xf32>
    %310 = tpu.reciprocal %309 {approx = true} : vector<8x1xf32> -> vector<8x1xf32>
    %311 = vector.broadcast %310 : vector<8x1xf32> to vector<8x8xf32>
    %312 = arith.mulf %307, %311 : vector<8x8xf32>
    %cst_106 = arith.constant dense<0.000000e+00> : vector<8x16xf32>
    %313 = tpu.matmul %312, %297, %cst_106 {dimension_numbers = #tpu.dot_dimension_numbers<[1], [0], [0], [1], [0, 0, 1, 1], [], []>} : vector<8x8xf32>, vector<8x16xf32>, vector<8x16xf32> -> vector<8x16xf32>
    %c8_107 = arith.constant 8 : index
    %c16_108 = arith.constant 16 : index
    %314 = vector.load %arg13[%c8_107, %c16_108] : memref<16x32xf32, #tpu.memory_space<vmem>>, vector<8x16xf32>
    tpu.vector_store %arg13[%c8_107, %c16_108], %313 {strides = array<i32>} : memref<16x32xf32, #tpu.memory_space<vmem>>, vector<8x16xf32>,
    %c0_109 = arith.constant 0 : index
    %c0_110 = arith.constant 0 : index
    %315 = vector.load %arg13[%c0_109, %c0_110] : memref<16x32xf32, #tpu.memory_space<vmem>>, vector<16x32xf32>
    %c1_111 = arith.constant 1 : index
    %c0_112 = arith.constant 0 : index
    %c0_113 = arith.constant 0 : index
    %316 = vector.load %arg6[%c1_111, %c0_112, %c0_113] : memref<2x32x32xf32, #tpu.memory_space<vmem>>, vector<1x32x32xf32>
    %317 = vector.shape_cast %316 : vector<1x32x32xf32> to vector<32x32xf32>
    %cst_114 = arith.constant dense<0.000000e+00> : vector<16x32xf32>
    %318 = tpu.matmul %315, %317, %cst_114 {dimension_numbers = #tpu.dot_dimension_numbers<[1], [0], [0], [1], [0, 0, 1, 1], [], []>} : vector<16x32xf32>, vector<32x32xf32>, vector<16x32xf32> -> vector<16x32xf32>
    %319 = vector.broadcast %215 : vector<1x32xf32> to vector<16x32xf32>
    %320 = arith.addf %318, %319 : vector<16x32xf32>
    %321 = arith.addf %320, %211 : vector<16x32xf32>
    %cst_115 = arith.constant dense<0.000000e+00> : vector<16xf32>
    %322 = vector.multi_reduction <add>, %321, %cst_115 [1] : vector<16x32xf32> to vector<16xf32>
    %323 = vector.shape_cast %322 : vector<16xf32> to vector<16x1xf32>
    %cst_116 = arith.constant 3.200000e+01 : f32
    %324 = vector.broadcast %cst_116 : f32 to vector<16x1xf32>
    %325 = arith.divf %323, %324 : vector<16x1xf32>
    %326 = vector.broadcast %325 : vector<16x1xf32> to vector<16x32xf32>
    %327 = arith.subf %321, %326 : vector<16x32xf32>
    %328 = arith.mulf %327, %327 : vector<16x32xf32>
    %cst_117 = arith.constant dense<0.000000e+00> : vector<16xf32>
    %329 = vector.multi_reduction <add>, %328, %cst_117 [1] : vector<16x32xf32> to vector<16xf32>
    %330 = vector.shape_cast %329 : vector<16xf32> to vector<16x1xf32>
    %cst_118 = arith.constant 3.200000e+01 : f32
    %331 = vector.broadcast %cst_118 : f32 to vector<16x1xf32>
    %332 = arith.divf %330, %331 : vector<16x1xf32>
    %cst_119 = arith.constant 9.99999996E-13 : f32
    %333 = vector.broadcast %cst_119 : f32 to vector<16x1xf32>
    %334 = arith.addf %332, %333 : vector<16x1xf32>
    %335 = math.rsqrt %334 : vector<16x1xf32>
    %336 = vector.broadcast %335 : vector<16x1xf32> to vector<16x32xf32>
    %337 = arith.mulf %327, %336 : vector<16x32xf32>
    %338 = vector.broadcast %218 : vector<1x32xf32> to vector<16x32xf32>
    %339 = arith.mulf %337, %338 : vector<16x32xf32>
    %340 = vector.broadcast %219 : vector<1x32xf32> to vector<16x32xf32>
    %341 = arith.addf %339, %340 : vector<16x32xf32>
    %c1_120 = arith.constant 1 : index
    %c0_121 = arith.constant 0 : index
    %c0_122 = arith.constant 0 : index
    %342 = vector.load %arg7[%c1_120, %c0_121, %c0_122] : memref<2x32x64xf32, #tpu.memory_space<vmem>>, vector<1x32x64xf32>
    %343 = vector.shape_cast %342 : vector<1x32x64xf32> to vector<32x64xf32>
    %cst_123 = arith.constant dense<0.000000e+00> : vector<16x64xf32>
    %344 = tpu.matmul %341, %343, %cst_123 {dimension_numbers = #tpu.dot_dimension_numbers<[1], [0], [0], [1], [0, 0, 1, 1], [], []>} : vector<16x32xf32>, vector<32x64xf32>, vector<16x64xf32> -> vector<16x64xf32>
    %345 = vector.broadcast %216 : vector<1x64xf32> to vector<16x64xf32>
    %346 = arith.addf %344, %345 : vector<16x64xf32>
    %cst_124 = arith.constant 5.000000e-01 : f32
    %347 = vector.broadcast %cst_124 : f32 to vector<16x64xf32>
    %348 = arith.mulf %347, %346 : vector<16x64xf32>
    %cst_125 = arith.constant 4.471500e-02 : f32
    %349 = vector.broadcast %cst_125 : f32 to vector<16x64xf32>
    %350 = arith.mulf %349, %346 : vector<16x64xf32>
    %351 = arith.mulf %350, %346 : vector<16x64xf32>
    %352 = arith.mulf %351, %346 : vector<16x64xf32>
    %353 = arith.addf %346, %352 : vector<16x64xf32>
    %cst_126 = arith.constant 0.797884583 : f32
    %354 = vector.broadcast %cst_126 : f32 to vector<16x64xf32>
    %355 = arith.mulf %354, %353 : vector<16x64xf32>
    %356 = math.tanh %355 : vector<16x64xf32>
    %cst_127 = arith.constant 1.000000e+00 : f32
    %357 = vector.broadcast %cst_127 : f32 to vector<16x64xf32>
    %358 = arith.addf %357, %356 : vector<16x64xf32>
    %359 = arith.mulf %348, %358 : vector<16x64xf32>
    %c1_128 = arith.constant 1 : index
    %c0_129 = arith.constant 0 : index
    %c0_130 = arith.constant 0 : index
    %360 = vector.load %arg8[%c1_128, %c0_129, %c0_130] : memref<2x64x32xf32, #tpu.memory_space<vmem>>, vector<1x64x32xf32>
    %361 = vector.shape_cast %360 : vector<1x64x32xf32> to vector<64x32xf32>
    %cst_131 = arith.constant dense<0.000000e+00> : vector<16x32xf32>
    %362 = tpu.matmul %359, %361, %cst_131 {dimension_numbers = #tpu.dot_dimension_numbers<[1], [0], [0], [1], [0, 0, 1, 1], [], []>} : vector<16x64xf32>, vector<64x32xf32>, vector<16x32xf32> -> vector<16x32xf32>
    %363 = vector.broadcast %217 : vector<1x32xf32> to vector<16x32xf32>
    %364 = arith.addf %362, %363 : vector<16x32xf32>
    %365 = arith.addf %364, %341 : vector<16x32xf32>
    %cst_132 = arith.constant dense<0.000000e+00> : vector<16xf32>
    %366 = vector.multi_reduction <add>, %365, %cst_132 [1] : vector<16x32xf32> to vector<16xf32>
    %367 = vector.shape_cast %366 : vector<16xf32> to vector<16x1xf32>
    %cst_133 = arith.constant 3.200000e+01 : f32
    %368 = vector.broadcast %cst_133 : f32 to vector<16x1xf32>
    %369 = arith.divf %367, %368 : vector<16x1xf32>
    %370 = vector.broadcast %369 : vector<16x1xf32> to vector<16x32xf32>
    %371 = arith.subf %365, %370 : vector<16x32xf32>
    %372 = arith.mulf %371, %371 : vector<16x32xf32>
    %cst_134 = arith.constant dense<0.000000e+00> : vector<16xf32>
    %373 = vector.multi_reduction <add>, %372, %cst_134 [1] : vector<16x32xf32> to vector<16xf32>
    %374 = vector.shape_cast %373 : vector<16xf32> to vector<16x1xf32>
    %cst_135 = arith.constant 3.200000e+01 : f32
    %375 = vector.broadcast %cst_135 : f32 to vector<16x1xf32>
    %376 = arith.divf %374, %375 : vector<16x1xf32>
    %cst_136 = arith.constant 9.99999996E-13 : f32
    %377 = vector.broadcast %cst_136 : f32 to vector<16x1xf32>
    %378 = arith.addf %376, %377 : vector<16x1xf32>
    %379 = math.rsqrt %378 : vector<16x1xf32>
    %380 = vector.broadcast %379 : vector<16x1xf32> to vector<16x32xf32>
    %381 = arith.mulf %371, %380 : vector<16x32xf32>
    %382 = vector.broadcast %220 : vector<1x32xf32> to vector<16x32xf32>
    %383 = arith.mulf %381, %382 : vector<16x32xf32>
    %384 = vector.broadcast %221 : vector<1x32xf32> to vector<16x32xf32>
    %385 = arith.addf %383, %384 : vector<16x32xf32>
    %c0_137 = arith.constant 0 : index
    %c0_138 = arith.constant 0 : index
    %386 = vector.load %arg10[%c0_137, %c0_138] : memref<33x128xf32, #tpu.memory_space<vmem>>, vector<32x128xf32>
    %cst_139 = arith.constant dense<0.000000e+00> : vector<16x128xf32>
    %387 = tpu.matmul %385, %386, %cst_139 {dimension_numbers = #tpu.dot_dimension_numbers<[1], [0], [0], [1], [0, 0, 1, 1], [], []>} : vector<16x32xf32>, vector<32x128xf32>, vector<16x128xf32> -> vector<16x128xf32>
    %c32 = arith.constant 32 : index
    %c0_140 = arith.constant 0 : index
    %388 = vector.load %arg10[%c32, %c0_140] : memref<33x128xf32, #tpu.memory_space<vmem>>, vector<1x128xf32>
    %389 = vector.broadcast %388 : vector<1x128xf32> to vector<16x128xf32>
    %390 = arith.addf %387, %389 : vector<16x128xf32>
    %391 = vector.extract_strided_slice %390 {offsets = [0, 0], sizes = [8, 128], strides = [1, 1]} : vector<16x128xf32> to vector<8x128xf32>
    %c0_141 = arith.constant 0 : index
    %c0_142 = arith.constant 0 : index
    %c0_143 = arith.constant 0 : index
    %392 = vector.load %arg12[%c0_141, %c0_142, %c0_143] : memref<2x8x128xf32, #tpu.memory_space<vmem>>, vector<1x8x128xf32>
    %393 = vector.shape_cast %392 : vector<1x8x128xf32> to vector<8x128xf32>
    %394 = vector.shape_cast %391 : vector<8x128xf32> to vector<1x8x128xf32>
    tpu.vector_store %arg12[%c0_141, %c0_142, %c0_143], %394 {strides = array<i32>} : memref<2x8x128xf32, #tpu.memory_space<vmem>>, vector<1x8x128xf32>,
    %395 = vector.extract_strided_slice %390 {offsets = [8, 0], sizes = [8, 128], strides = [1, 1]} : vector<16x128xf32> to vector<8x128xf32>
    %c1_144 = arith.constant 1 : index
    %c0_145 = arith.constant 0 : index
    %c0_146 = arith.constant 0 : index
    %396 = vector.load %arg12[%c1_144, %c0_145, %c0_146] : memref<2x8x128xf32, #tpu.memory_space<vmem>>, vector<1x8x128xf32>
    %397 = vector.shape_cast %396 : vector<1x8x128xf32> to vector<8x128xf32>
    %398 = vector.shape_cast %395 : vector<8x128xf32> to vector<1x8x128xf32>
    tpu.vector_store %arg12[%c1_144, %c0_145, %c0_146], %398 {strides = array<i32>} : memref<2x8x128xf32, #tpu.memory_space<vmem>>, vector<1x8x128xf32>,
    %c0_147 = arith.constant 0 : index
    %c0_148 = arith.constant 0 : index
    %399 = vector.load %arg3[%c0_147, %c0_148] : memref<16x1xi32, #tpu.memory_space<vmem>>, vector<16x1xi32>
    %400 = tpu.iota {dimensions = array<i32: 1>} : vector<16x128xi32>
    %c12_i32 = arith.constant 12 : i32
    %401 = vector.broadcast %c12_i32 : i32 to vector<16x128xi32>
    %402 = arith.cmpi slt, %400, %401 : vector<16x128xi32>
    %cst_149 = arith.constant -1.000000e+30 : f32
    %403 = vector.broadcast %cst_149 : f32 to vector<16x128xf32>
    %404 = arith.select %402, %390, %403 : vector<16x128xi1>, vector<16x128xf32>
    %cst_150 = arith.constant dense<0xFF800000> : vector<16xf32>
    %405 = vector.multi_reduction <maximumf>, %404, %cst_150 [1] : vector<16x128xf32> to vector<16xf32>
    %406 = vector.shape_cast %405 : vector<16xf32> to vector<16x1xf32>
    %407 = vector.broadcast %406 : vector<16x1xf32> to vector<16x128xf32>
    %408 = arith.subf %404, %407 : vector<16x128xf32>
    %409 = math.exp %408 : vector<16x128xf32>
    %cst_151 = arith.constant dense<0.000000e+00> : vector<16xf32>
    %410 = vector.multi_reduction <add>, %409, %cst_151 [1] : vector<16x128xf32> to vector<16xf32>
    %411 = vector.shape_cast %410 : vector<16xf32> to vector<16x1xf32>
    %412 = math.log %411 : vector<16x1xf32>
    %413 = arith.addf %412, %406 : vector<16x1xf32>
    %414 = vector.broadcast %399 : vector<16x1xi32> to vector<16x128xi32>
    %415 = arith.cmpi eq, %400, %414 : vector<16x128xi32>
    %cst_152 = arith.constant 0.000000e+00 : f32
    %416 = vector.broadcast %cst_152 : f32 to vector<16x128xf32>
    %417 = arith.select %415, %390, %416 : vector<16x128xi1>, vector<16x128xf32>
    %cst_153 = arith.constant dense<0.000000e+00> : vector<16xf32>
    %418 = vector.multi_reduction <add>, %417, %cst_153 [1] : vector<16x128xf32> to vector<16xf32>
    %419 = vector.shape_cast %418 : vector<16xf32> to vector<16x1xf32>
    %c-100_i32 = arith.constant -100 : i32
    %420 = vector.broadcast %c-100_i32 : i32 to vector<16x1xi32>
    %421 = arith.cmpi ne, %399, %420 : vector<16x1xi32>
    %422 = arith.extui %421 : vector<16x1xi1> to vector<16x1xi32>
    %423 = arith.sitofp %422 : vector<16x1xi32> to vector<16x1xf32>
    %424 = arith.subf %413, %419 : vector<16x1xf32>
    %425 = arith.mulf %424, %423 : vector<16x1xf32>
    %426 = vector.shape_cast %425 : vector<16x1xf32> to vector<1x16x1xf32>
    %cst_154 = arith.constant dense<0.000000e+00> : vector<1xf32>
    %427 = vector.multi_reduction <add>, %426, %cst_154 [1, 2] : vector<1x16x1xf32> to vector<1xf32>
    %428 = vector.shape_cast %427 : vector<1xf32> to vector<1x1x1xf32>
    %429 = vector.extract %428[0, 0, 0] : f32 from vector<1x1x1xf32>
    %430 = vector.broadcast %429 : f32 to vector<1x1xf32>
    %431 = vector.shape_cast %423 : vector<16x1xf32> to vector<1x16x1xf32>
    %cst_155 = arith.constant dense<0.000000e+00> : vector<1xf32>
    %432 = vector.multi_reduction <add>, %431, %cst_155 [1, 2] : vector<1x16x1xf32> to vector<1xf32>
    %433 = vector.shape_cast %432 : vector<1xf32> to vector<1x1x1xf32>
    %434 = vector.extract %433[0, 0, 0] : f32 from vector<1x1x1xf32>
    %435 = vector.broadcast %434 : f32 to vector<1x1xf32>
    %cst_156 = arith.constant 1.000000e+00 : f32
    %436 = vector.broadcast %cst_156 : f32 to vector<1x1xf32>
    %437 = arith.maximumf %435, %436 : vector<1x1xf32>
    %438 = arith.divf %430, %437 : vector<1x1xf32>
    %c0_157 = arith.constant 0 : index
    %c0_158 = arith.constant 0 : index
    %439 = vector.load %arg11[%c0_157, %c0_158] : memref<1x1xf32, #tpu.memory_space<vmem>>, vector<1x1xf32>
    tpu.vector_store %arg11[%c0_157, %c0_158], %438 {strides = array<i32>} : memref<1x1xf32, #tpu.memory_space<vmem>>, vector<1x1xf32>,
    return
  }
  func.func @transform_0(%arg0: i32) -> (i32, i32) {
    %c0_i32 = arith.constant 0 : i32
    %c0_i32_0 = arith.constant 0 : i32
    %c0_i32_1 = arith.constant 0 : i32
    return %c0_i32, %c0_i32_0 : i32, i32
  }
  func.func @transform_1(%arg0: i32) -> (i32, i32) {
    %c0_i32 = arith.constant 0 : i32
    %c0_i32_0 = arith.constant 0 : i32
    %c0_i32_1 = arith.constant 0 : i32
    return %c0_i32, %c0_i32_0 : i32, i32
  }
  func.func @transform_2(%arg0: i32) -> (i32, i32) {
    %c0_i32 = arith.constant 0 : i32
    %c0_i32_0 = arith.constant 0 : i32
    %c0_i32_1 = arith.constant 0 : i32
    return %c0_i32, %c0_i32_0 : i32, i32
  }
  func.func @transform_3(%arg0: i32) -> (i32, i32) {
    %c0_i32 = arith.constant 0 : i32
    %c0_i32_0 = arith.constant 0 : i32
    %c0_i32_1 = arith.constant 0 : i32
    return %c0_i32, %c0_i32_0 : i32, i32
  }
  func.func @transform_4(%arg0: i32) -> (i32, i32, i32) {
    %c0_i32 = arith.constant 0 : i32
    %c0_i32_0 = arith.constant 0 : i32
    %c0_i32_1 = arith.constant 0 : i32
    %c0_i32_2 = arith.constant 0 : i32
    return %c0_i32, %c0_i32_0, %c0_i32_1 : i32, i32, i32
  }
  func.func @transform_5(%arg0: i32) -> (i32, i32, i32) {
    %c0_i32 = arith.constant 0 : i32
    %c0_i32_0 = arith.constant 0 : i32
    %c0_i32_1 = arith.constant 0 : i32
    %c0_i32_2 = arith.constant 0 : i32
    return %c0_i32, %c0_i32_0, %c0_i32_1 : i32, i32, i32
  }
  func.func @transform_6(%arg0: i32) -> (i32, i32, i32) {
    %c0_i32 = arith.constant 0 : i32
    %c0_i32_0 = arith.constant 0 : i32
    %c0_i32_1 = arith.constant 0 : i32
    %c0_i32_2 = arith.constant 0 : i32
    return %c0_i32, %c0_i32_0, %c0_i32_1 : i32, i32, i32
  }
  func.func @transform_7(%arg0: i32) -> (i32, i32, i32) {
    %c0_i32 = arith.constant 0 : i32
    %c0_i32_0 = arith.constant 0 : i32
    %c0_i32_1 = arith.constant 0 : i32
    %c0_i32_2 = arith.constant 0 : i32
    return %c0_i32, %c0_i32_0, %c0_i32_1 : i32, i32, i32
  }
  func.func @transform_8(%arg0: i32) -> (i32, i32, i32) {
    %c0_i32 = arith.constant 0 : i32
    %c0_i32_0 = arith.constant 0 : i32
    %c0_i32_1 = arith.constant 0 : i32
    %c0_i32_2 = arith.constant 0 : i32
    return %c0_i32, %c0_i32_0, %c0_i32_1 : i32, i32, i32
  }
  func.func @transform_9(%arg0: i32) -> (i32, i32) {
    %c0_i32 = arith.constant 0 : i32
    %c0_i32_0 = arith.constant 0 : i32
    %c0_i32_1 = arith.constant 0 : i32
    return %c0_i32, %c0_i32_0 : i32, i32
  }
  func.func @transform_10(%arg0: i32) -> (i32, i32) {
    %c0_i32 = arith.constant 0 : i32
    %c0_i32_0 = arith.constant 0 : i32
    %c0_i32_1 = arith.constant 0 : i32
    return %c0_i32, %c0_i32_0 : i32, i32
  }
  func.func @transform_11(%arg0: i32) -> (i32, i32, i32) {
    %c0_i32 = arith.constant 0 : i32
    %c0_i32_0 = arith.constant 0 : i32
    %c0_i32_1 = arith.constant 0 : i32
    %c0_i32_2 = arith.constant 0 : i32
    return %c0_i32, %c0_i32_0, %c0_i32_1 : i32, i32, i32
  }
}

</mosaic_0001>

<bundles_post_ra>
// kernel: bert_forward.1
= control target key start
LH: loop header
LB: loop body
LE: loop exit
PB: predicated region body
PF: predicated region fallthrough
CT: control target
= control target key end

     0   :  { %17 = vsyncpa [#allocation4], 0  ;;  %v3361_v2 = vmov 0   ;;  %s3969_s0 = inlined_call_operand.vmem [shape: s32[16,1], index: 0, kind: input, shape index: {}]   ;;  %s3970_s1 = inlined_call_operand.vmem [shape: f32[2,8], index: 1, kind: input, shape index: {}]   ;;  %s3971_s2 = inlined_call_operand.vmem [shape: s32[16,1], index: 2, kind: input, shape index: {}]   ;;  %s3972_s3 = inlined_call_operand.vmem [shape: f32[146,32], index: 3, kind: input, shape index: {}]   ;;  %s3973_s4 = inlined_call_operand.vmem [shape: f32[2,32,96], index: 4, kind: input, shape index: {}]   ;;  %s3974_s5 = inlined_call_operand.vmem [shape: f32[2,32,32], index: 5, kind: input, shape index: {}]   ;;  %s3975_s6 = inlined_call_operand.vmem [shape: f32[2,32,64], index: 6, kind: input, shape index: {}]   ;;  %s3976_s7 = inlined_call_operand.vmem [shape: f32[2,64,32], index: 7, kind: input, shape index: {}]   ;;  %s3977_s8 = inlined_call_operand.vmem [shape: f32[2,8,96], index: 8, kind: input, shape index: {}]   ;;  %s3978_s9 = inlined_call_operand.vmem [shape: f32[33,128], index: 9, kind: input, shape index: {}]   ;;  %s3979_s10 = inlined_call_operand.hbm [shape: f32[1,1], index: 10, kind: output, shape index: {0}]   ;;  %s3980_s11 = inlined_call_operand.hbm [shape: f32[2,8,128], index: 11, kind: output, shape index: {1}]  }
   0x1   :  { %v39_v0 = vld [vmem:[%s3969_s0] sm:$0xff]  ;;  %3241 = vset.pattern.permute.xlu0 %v3361_v2  ;;  %v56_v3 = vld [vmem:[%s3972_s3 + $0x8] sm:$0xff]  ;;  %v57_v4 = vld [vmem:[%s3972_s3 + $0x10] sm:$0xff]  ;;  %3242 = vset.pattern.permute.xlu1 %v3361_v2 }
   0x2   :  { %v55_v1 = vld [vmem:[%s3972_s3] sm:$0xff]  ;;  %v58_v5 = vld [vmem:[%s3972_s3 + $0x18] sm:$0xff]  ;;  %44 = vperm.xlu0 %3241, %v39_v0   ;;  %v40_v8 = vld [vmem:[%s3969_s0 + $0x8] sm:$0xff] }
   0x3   :  { %v3103_v6 = vpack.c.bf16 %v56_v3, %v55_v1  ;;  %v3107_v7 = vpack.c.bf16 %v58_v5, %v57_v4  ;;  %v59_v9 = vld [vmem:[%s3972_s3 + $0x20] sm:$0xff]  ;;  %v60_v10 = vld [vmem:[%s3972_s3 + $0x28] sm:$0xff] }
   0x4   :  { %v3111_v11 = vpack.c.bf16 %v60_v10, %v59_v9 }
   0x5   :  { %3104 = vmatprep.subr.bf16.mxu0 %v3103_v6 }
   0x6   :  { %3106 = vmatpush3.bf16.msra.mxu0 %v3103_v6  ;;  %47 = vperm.xlu0 %3241, %v40_v8  }
   0x7   :  { %3108 = vmatprep.subr.bf16.mxu0 %v3107_v7 }
   0x8   :  { %18 = vsyncpa [#allocation6], 0  ;;  %v61_v12 = vld [vmem:[%s3972_s3 + $0x30] sm:$0xff]  ;;  %v62_v13 = vld [vmem:[%s3972_s3 + $0x38] sm:$0xff]  ;;  %v41_v27 = vlaneseq  ;;  %v3362_v30 = vmov 1.0   ;;  %vm149_vm2 = vcmask 261120  }
   0x9   :  { %v3115_v14 = vpack.c.bf16 %v62_v13, %v61_v12  ;;  %v63_v15 = vld [vmem:[%s3972_s3 + $0x40] sm:$0xff]  ;;  %v64_v16 = vld [vmem:[%s3972_s3 + $0x48] sm:$0xff]  ;;  %v65_v18 = vld [vmem:[%s3972_s3 + $0x50] sm:$0xff]  ;;  %v3363_v12 = vmov 0.0   ;;  %vm3364_vm3 = vmmov 0   ;;  %s3365_s28 = smov 64  }
   0xa   :  { %3110 = vmatpush3.bf16.msra.mxu0 %v3107_v7  ;;  %v3119_v17 = vpack.c.bf16 %v64_v16, %v63_v15  ;;  %v66_v19 = vld [vmem:[%s3972_s3 + $0x58] sm:$0xff]  ;;  %v67_v21 = vld [vmem:[%s3972_s3 + $0x60] sm:$0xff]  ;;  %v68_v22 = vld [vmem:[%s3972_s3 + $0x68] sm:$0xff]  ;;  %v3489_v28 = vand.u32 127, %v41_v27  ;;  %v3515_v61 = vshrl.u32 %v41_v27, 7  ;;  %s3366_s29 = smov 96  }
   0xb   :  { %3112 = vmatprep.subr.bf16.mxu0 %v3111_v11  ;;  %v3123_v20 = vpack.c.bf16 %v66_v19, %v65_v18  ;;  %v3127_v23 = vpack.c.bf16 %v68_v22, %v67_v21  ;;  %v69_v24 = vld [vmem:[%s3972_s3 + $0x70] sm:$0xff]  ;;  %v70_v25 = vld [vmem:[%s3972_s3 + $0x78] sm:$0xff]  ;;  %v71_v32 = vld [vmem:[%s3972_s3 + $0x80] sm:$0xff]  ;;  %vm285_vm4 = vcmask 130048   ;;  %vm366_vm5 = vcmask 64512   ;;  %s3367_s13 = smov 112  }
   0xc   :  { %v3131_v26 = vpack.c.bf16 %v70_v25, %v69_v24  ;;  %v72_v34 = vld [vmem:[%s3972_s3 + $0x88] sm:$0xff]  ;;  %v193_v50 = vld [vmem:[%s3973_s4] sm:$0xff]  ;;  %v195_v52 = vld [vmem:[%s3973_s4 + $0x10] sm:$0xff]  ;;  %v3518_v63 = vsub.s32 0, %v3515_v61  ;;  %v3524_v1 = vsub.s32 1, %v3515_v61  ;;  %s3369_s14 = smov 48  }
   0xd   :  { %v194_v51 = vld [vmem:[%s3973_s4 + $0x8] sm:$0xff]  ;;  %v196_v54 = vld [vmem:[%s3973_s4 + $0x18] sm:$0xff]  ;;  %v148_v0 = vld [vmem:[%s3972_s3 + $0x90] sm:$0x3]  ;;  %s3370_s15 = smov 16   ;;  %vm626_vm6 = vcmask 261248  }
   0xe   :  { %3114 = vmatpush3.bf16.msra.mxu0 %v3111_v11  ;;  %v3135_v53 = vpack.c.bf16 %v194_v51, %v193_v50  ;;  %v3139_v55 = vpack.c.bf16 %v196_v54, %v195_v52  ;;  %v180_v2 = vrot.slane %v148_v0, %v3518_v63  ;;  %v186_v5 = vrot.slane %v148_v0, %v3524_v1  ;;  %v3542_v13 = vld [vmem:[%s3977_s8] sm:$0xff] }
   0xf   :  { %3116 = vmatprep.subr.bf16.mxu0 %v3115_v14  ;;  %v189_v21 = vld [vmem:[%s3970_s1] sm:$0x3]  ;;  %s3368_s1 = smov 80   ;;  %vm1221_vm7 = vcmask 523264   ;;  %vm2582_vm8 = vcmp.lt.s32.totalorder %v3489_v28, 12  ;;  %vm2629_vm13 = vcmask 7168  }
  0x10   :  { %3136 = vmatprep.subr.bf16.mxu1 %v3135_v53  ;;  %v190_v22 = vsub.f32 1.0, %v189_v21 }
  0x11   :  { %3138 = vmatpush3.bf16.msra.mxu1 %v3135_v53 }
  0x12   :  { %3118 = vmatpush3.bf16.msra.mxu0 %v3115_v14  ;;  %3140 = vmatprep.subr.bf16.mxu1 %v3139_v55  ;;  %v200_v14 = vrot.slane %v3542_v13, %v3518_v63 }
  0x13   :  { %3120 = vmatprep.subr.bf16.mxu0 %v3119_v17 }
  0x15   :  { %3142 = vmatpush3.bf16.msra.mxu1 %v3139_v55 }
  0x16   :  { %3122 = vmatpush3.bf16.msra.mxu0 %v3119_v17  ;;  %2919 = vmatprep.subr.mxu1 %v3363_v12 }
  0x17   :  { %3124 = vmatprep.subr.bf16.mxu0 %v3123_v20 }
  0x1a   :  { %3126 = vmatpush3.bf16.msra.mxu0 %v3123_v20 }
  0x1b   :  { %3128 = vmatprep.subr.bf16.mxu0 %v3127_v23 }
  0x1e   :  { %3130 = vmatpush3.bf16.msra.mxu0 %v3127_v23  ;;  %v3559_v23 = vmul.f32 -1e+09, %v190_v22 }
  0x1f   :  { %3132 = vmatprep.subr.bf16.mxu0 %v3131_v26 }
  0x20   :  { %v3563_v24 = vrot.slane %v3559_v23, %v3518_v63 }
  0x22   :  { %3134 = vmatpush3.bf16.msra.mxu0 %v3131_v26 }
  0x81   :  { %v45_v29 = vpop.permute.xlu0 %44 }
  0x82   :  { %vm49_vm0 = vcmp.eq.s32.totalorder %v3489_v28, %v45_v29 }
  0x83   :  { %2905 = vmatprep.mubr.msk.f32.mxu0 %vm49_vm0, %v3362_v30 }
  0x85   :  { %v48_v31 = vpop.permute.xlu0 %47 }
  0x86   :  { %vm50_vm1 = vcmp.eq.s32.totalorder %v3489_v28, %v48_v31 }
  0x87   :  { %2906 = vmatmul.mubr.msk.f32.vlgmr.msra.gmra.mrb[0].mxu0 %vm50_vm1, %v3362_v30 }
 0x15a   :  { %v2907_v33 = vpop.f32.mrb[0].mxu0 }
 0x15b   :  { %v139_v35 = vpop.f32.mrb[1].mxu0  ;;  %v145_v37 = vadd.f32 %v2907_v33, %v72_v34 }
 0x15c   :  { %v140_v36 = vadd.f32 %v139_v35, %v71_v32 }
 0x15d   :  { %v153_v39 = vsel %vm149_vm2, %v145_v37, 0.0 }
 0x15e   :  { %v150_v38 = vsel %vm149_vm2, %v140_v36, 0.0 }
 0x15f   :  { %151 = vadd.xlane.f32.xlu1 %v150_v38 }
 0x163   :  { %154 = vadd.xlane.f32.xlu1 %v153_v39 }
 0x1ec   :  { %v152_v40 = vpop.xlane.xlu1 %151 }
 0x1ed   :  { %v157_v41 = vmul.f32 0.03125, %v152_v40 }
 0x1ef   :  { %v159_v42 = vsub.f32 %v140_v36, %v157_v41 }
 0x1f0   :  { %v155_v43 = vpop.xlane.xlu1 %154 }
 0x1f1   :  { %v158_v44 = vmul.f32 0.03125, %v155_v43  ;;  %v161_v45 = vmul.f32 %v159_v42, %v159_v42 }
 0x1f3   :  { %v160_v46 = vsub.f32 %v145_v37, %v158_v44  ;;  %v163_v47 = vsel %vm149_vm2, %v161_v45, 0.0 }
 0x1f4   :  { %164 = vadd.xlane.f32.xlu0 %v163_v47 }
 0x1f5   :  { %v162_v48 = vmul.f32 %v160_v46, %v160_v46 }
 0x1f7   :  { %v166_v49 = vsel %vm149_vm2, %v162_v48, 0.0 }
 0x1f8   :  { %167 = vadd.xlane.f32.xlu1 %v166_v49 }
 0x281   :  { %v165_v56 = vpop.xlane.xlu0 %164 }
 0x282   :  { %v169_v57 = vmul.f32 0.03125, %v165_v56 }
 0x284   :  { %v171_v58 = vadd.f32 1e-12, %v169_v57 }
 0x285   :  { %v168_v59 = vpop.xlane.xlu1 %167 }
 0x286   :  { %3243 = vrsqrt.f32 %v171_v58  ;;  %v170_v60 = vmul.f32 0.03125, %v168_v59 }
 0x288   :  { %v172_v62 = vadd.f32 1e-12, %v170_v60  ;;  %v3597_v60 = vrot.slane %v3559_v23, %v3524_v1 }
 0x28a   :  { %3245 = vrsqrt.f32 %v172_v62 }
 0x290   :  { %v3244_v3 = vpop.eup %3243 }
 0x291   :  { %v175_v4 = vmul.f32 %v3244_v3, %v159_v42 }
 0x293   :  { %v181_v6 = vmul.f32 %v180_v2, %v175_v4 }
 0x294   :  { %v3246_v7 = vpop.eup %3245 }
 0x295   :  { %v176_v8 = vmul.f32 %v3246_v7, %v160_v46  ;;  %v3528_v9 = vadd.f32 %v186_v5, %v181_v6 }
 0x297   :  { %v182_v10 = vmul.f32 %v180_v2, %v176_v8  ;;  %2916 = vmatprep.mubr.msk.f32.mxu1 %vm149_vm2, %v3528_v9 }
 0x299   :  { %v3532_v11 = vadd.f32 %v186_v5, %v182_v10 }
 0x29b   :  { %2917 = vmatmul.mubr.msk.f32.vlgmr.msra.gmra.mrb[0].mxu1 %vm149_vm2, %v3532_v11 }
 0x29c   :  { %2921 = vmatprep.mubr.msk.f32.mxu1 %vm3364_vm3, %v3363_v12 }
 0x36e   :  { %v2918_v15 = vpop.f32.mrb[0].mxu1 }
 0x36f   :  { %v3546_v16 = vadd.f32 %v2918_v15, %v200_v14  ;;  %v273_v17 = vpop.f32.mrb[1].mxu1 }
 0x370   :  { %v274_v18 = vadd.f32 %v273_v17, %v200_v14 }
 0x372   :  { %378 = vrot.lane.b32.xlu0 %v274_v18, %s3365_s28  ;;  %283 = vrot.lane.b32.xlu1 %v274_v18, %s3366_s29 }
 0x3e4   :  { %v284_v19 = vpop.permute.xlu1 %283  ;;  %v379_v20 = vpop.permute.xlu0 %378 }
 0x3e5   :  { %2920 = vmatpush3.xpose.msk.msra.mxu1 %vm285_vm4, %v284_v19 }
 0x3e6   :  { %2924 = vmatprep.subr.mxu1 %v3363_v12 }
 0x3e8   :  { %2922 = vmatmul.mubr.msk.f32.vlgmr.msra.gmra.mrb[2].mxu1 %vm285_vm4, %v274_v18 }
 0x3e9   :  { %2925 = vmatpush3.msra.mxu1 %v379_v20  ;;  %2926 = vmatprep.mubr.msk.f32.mxu1 %vm3364_vm3, %v3363_v12 }
 0x3ea   :  { %2929 = vmatprep.subr.mxu1 %v3363_v12 }
 0x4bb   :  { %v356_v25 = vpop.f32.mrb[2].mxu1 }
 0x4bc   :  { %v360_v26 = vmul.f32 0.25, %v356_v25  ;;  %v2923_v27 = vpop.f32.mrb[3].mxu1 }
 0x4be   :  { %v365_v29 = vadd.f32 %v3563_v24, %v360_v26 }
 0x4c0   :  { %v367_v30 = vsel %vm366_vm5, %v365_v29, -inf }
 0x4c1   :  { %368 = vmax.xlane.f32.xlu1 %v367_v30 }
 0x4d2   :  { %455 = vrot.lane.b32.xlu1 %v274_v18, %s3367_s13 }
 0x54e   :  { %v369_v31 = vpop.xlane.xlu1 %368 }
 0x54f   :  { %v370_v32 = vsub.f32 %v365_v29, %v369_v31 }
 0x551   :  { %v371_v33 = vmul.f32 1.442695, %v370_v32 }
 0x552   :  { %v456_v40 = vpop.permute.xlu1 %455 }
 0x553   :  { %3247 = vpow2.f32 %v371_v33 }
 0x55d   :  { %v3248_v34 = vpop.eup %3247 }
 0x55e   :  { %v373_v35 = vsel %vm366_vm5, %v3248_v34, 0.0 }
 0x55f   :  { %374 = vadd.xlane.f32.xlu0 %v373_v35 }
 0x575   :  { %457 = vrot.lane.b32.xlu0 %v274_v18, %s3368_s1 }
 0x5ec   :  { %v375_v36 = vpop.xlane.xlu0 %374 }
 0x5ed   :  { %3249 = vrcp.f32 %v375_v36 }
 0x5f0   :  { %v458_v39 = vpop.permute.xlu0 %457 }
 0x5f7   :  { %v3250_v37 = vpop.eup %3249 }
 0x5f8   :  { %v377_v38 = vmul.f32 %v3250_v37, %v3248_v34 }
 0x5fa   :  { %2927 = vmatmul.mubr.msk.f32.vlgmr.msra.gmra.mrb[4].mxu1 %vm366_vm5, %v377_v38 }
 0x5fb   :  { %2930 = vmatpush3.xpose.msk.msra.mxu1 %vm285_vm4, %v458_v39  ;;  %2931 = vmatprep.mubr.msk.f32.mxu1 %vm3364_vm3, %v3363_v12 }
 0x5fc   :  { %2934 = vmatprep.subr.mxu1 %v3363_v12 }
 0x5fe   :  { %2932 = vmatmul.mubr.msk.f32.vlgmr.msra.gmra.mrb[6].mxu1 %vm285_vm4, %v456_v40  ;;  %v973_v40 = vld [vmem:[%s3974_s5] sm:$0xff] }
 0x5ff   :  { %2936 = vmatprep.mubr.msk.f32.mxu1 %vm3364_vm3, %v3363_v12 }
 0x6cd   :  { %v450_v41 = vpop.f32.mrb[4].mxu1 }
 0x6ce   :  { %454 = vst.msk [vmem:[#allocation2] sm:$0xff] %vm285_vm4, %v450_v41  ;;  %v2928_v42 = vpop.f32.mrb[5].mxu1  ;;  %v974_v41 = vld [vmem:[%s3974_s5 + $0x8] sm:$0xff] }
 0x6cf   :  { %v3143_v42 = vpack.c.bf16 %v974_v41, %v973_v40  ;;  %v1211_v40 = vld [vmem:[%s3976_s7 + $0x10] sm:$0xff]  ;;  %v1212_v41 = vld [vmem:[%s3976_s7 + $0x18] sm:$0xff] }
 0x6d1   :  { %v529_v43 = vpop.f32.mrb[6].mxu1  ;;  %3144 = vmatprep.subr.bf16.mxu0 %v3143_v42 }
 0x6d2   :  { %v533_v44 = vmul.f32 0.25, %v529_v43  ;;  %v2933_v45 = vpop.f32.mrb[7].mxu1  ;;  %v975_v43 = vld [vmem:[%s3974_s5 + $0x10] sm:$0xff]  ;;  %3146 = vmatpush3.bf16.msra.mxu0 %v3143_v42  ;;  %v3163_v42 = vpack.c.bf16 %v1212_v41, %v1211_v40  ;;  %v2717_v40 = vld [vmem:[%s3973_s4 + $0x28] sm:$0xff] }
 0x6d4   :  { %v534_v46 = vadd.f32 %v533_v44, %v3563_v24  ;;  %v976_v44 = vld [vmem:[%s3974_s5 + $0x18] sm:$0xff] }
 0x6d5   :  { %v3147_v45 = vpack.c.bf16 %v976_v44, %v975_v43  ;;  %v1213_v43 = vld [vmem:[%s3976_s7 + $0x20] sm:$0xff]  ;;  %v1214_v44 = vld [vmem:[%s3976_s7 + $0x28] sm:$0xff] }
 0x6d6   :  { %v535_v47 = vsel %vm366_vm5, %v534_v46, -inf }
 0x6d7   :  { %536 = vmax.xlane.f32.xlu0 %v535_v47  ;;  %3148 = vmatprep.subr.bf16.mxu0 %v3147_v45 }
 0x6d8   :  { %3150 = vmatpush3.bf16.msra.mxu0 %v3147_v45  ;;  %v3167_v45 = vpack.c.bf16 %v1214_v44, %v1213_v43  ;;  %v2719_v43 = vld [vmem:[%s3973_s4 + $0x38] sm:$0xff] }
 0x6ed   :  { %546 = vrot.lane.b32.xlu0 %v274_v18, %s3369_s14 }
 0x764   :  { %v537_v48 = vpop.xlane.xlu0 %536 }
 0x765   :  { %v538_v49 = vsub.f32 %v534_v46, %v537_v48 }
 0x767   :  { %v539_v50 = vmul.f32 1.442695, %v538_v49 }
 0x768   :  { %v547_v51 = vpop.permute.xlu0 %546 }
 0x769   :  { %3251 = vpow2.f32 %v539_v50  ;;  %2935 = vmatpush3.msra.mxu1 %v547_v51  ;;  %v980_v50 = vrot.slane %v3542_v13, %v3524_v1 }
 0x76a   :  { %2939 = vmatprep.subr.mxu1 %v3363_v12 }
 0x773   :  { %v3252_v52 = vpop.eup %3251 }
 0x774   :  { %v541_v53 = vsel %vm366_vm5, %v3252_v52, 0.0 }
 0x775   :  { %542 = vadd.xlane.f32.xlu1 %v541_v53 }
 0x786   :  { %629 = vrot.lane.b32.xlu1 %v3546_v16, %s3366_s29 }
 0x802   :  { %v543_v54 = vpop.xlane.xlu1 %542 }
 0x803   :  { %3253 = vrcp.f32 %v543_v54 }
 0x806   :  { %v630_v57 = vpop.permute.xlu1 %629 }
 0x80d   :  { %v3254_v55 = vpop.eup %3253 }
 0x80e   :  { %v545_v56 = vmul.f32 %v3254_v55, %v3252_v52 }
 0x810   :  { %2937 = vmatmul.mubr.msk.f32.vlgmr.msra.gmra.mrb[8].mxu1 %vm366_vm5, %v545_v56 }
 0x811   :  { %2940 = vmatpush3.xpose.msk.msra.mxu1 %vm285_vm4, %v630_v57  ;;  %2941 = vmatprep.mubr.msk.f32.mxu1 %vm3364_vm3, %v3363_v12 }
 0x812   :  { %2944 = vmatprep.subr.mxu1 %v3363_v12 }
 0x814   :  { %2942 = vmatmul.mubr.msk.f32.vlgmr.msra.gmra.mrb[10].mxu1 %vm285_vm4, %v3546_v16 }
 0x815   :  { %2946 = vmatprep.mubr.msk.f32.mxu1 %vm3364_vm3, %v3363_v12 }
 0x8e3   :  { %v618_v58 = vpop.f32.mrb[8].mxu1 }
 0x8e4   :  { %v2938_v59 = vpop.f32.mrb[9].mxu1 }
 0x8e7   :  { %v701_v62 = vpop.f32.mrb[10].mxu1 }
 0x8e8   :  { %v705_v0 = vmul.f32 0.25, %v701_v62  ;;  %v2943_v2 = vpop.f32.mrb[11].mxu1 }
 0x8ea   :  { %v710_v3 = vadd.f32 %v3597_v60, %v705_v0 }
 0x8ec   :  { %v711_v4 = vsel %vm366_vm5, %v710_v3, -inf }
 0x8ed   :  { %712 = vmax.xlane.f32.xlu0 %v711_v4 }
 0x903   :  { %722 = vrot.lane.b32.xlu0 %v3546_v16, %s3365_s28 }
 0x907   :  { %799 = vrot.lane.b32.xlu0 %v3546_v16, %s3367_s13 }
 0x97a   :  { %v713_v5 = vpop.xlane.xlu0 %712 }
 0x97b   :  { %v714_v6 = vsub.f32 %v710_v3, %v713_v5 }
 0x97d   :  { %v715_v7 = vmul.f32 1.442695, %v714_v6 }
 0x97e   :  { %v723_v8 = vpop.permute.xlu0 %722 }
 0x97f   :  { %3255 = vpow2.f32 %v715_v7  ;;  %2945 = vmatpush3.msra.mxu1 %v723_v8  ;;  %v1103_v8 = vld [vmem:[%s3975_s6 + $0x8] sm:$0xff] }
 0x980   :  { %2949 = vmatprep.subr.mxu1 %v3363_v12 }
 0x982   :  { %v800_v20 = vpop.permute.xlu0 %799 }
 0x989   :  { %v3256_v10 = vpop.eup %3255 }
 0x98a   :  { %v717_v14 = vsel %vm366_vm5, %v3256_v10, 0.0 }
 0x98b   :  { %718 = vadd.xlane.f32.xlu1 %v717_v14  ;;  %v1104_v14 = vld [vmem:[%s3975_s6 + $0x10] sm:$0xff] }
 0x99c   :  { %801 = vrot.lane.b32.xlu1 %v3546_v16, %s3368_s1 }
 0xa18   :  { %v719_v15 = vpop.xlane.xlu1 %718 }
 0xa19   :  { %3257 = vrcp.f32 %v719_v15  ;;  %v1105_v15 = vld [vmem:[%s3975_s6 + $0x18] sm:$0xff] }
 0xa1c   :  { %v802_v19 = vpop.permute.xlu1 %801 }
 0xa23   :  { %v3258_v17 = vpop.eup %3257 }
 0xa24   :  { %v721_v18 = vmul.f32 %v3258_v17, %v3256_v10  ;;  %v3155_v17 = vpack.c.bf16 %v1105_v15, %v1104_v14  ;;  %v1219_v15 = vsub.s32 3, %v3515_v61 }
 0xa26   :  { %2947 = vmatmul.mubr.msk.f32.vlgmr.msra.gmra.mrb[12].mxu1 %vm366_vm5, %v721_v18 }
 0xa27   :  { %2950 = vmatpush3.xpose.msk.msra.mxu1 %vm285_vm4, %v802_v19  ;;  %2951 = vmatprep.mubr.msk.f32.mxu1 %vm3364_vm3, %v3363_v12 }
 0xa28   :  { %2954 = vmatprep.subr.mxu1 %v3363_v12 }
 0xa2a   :  { %2952 = vmatmul.mubr.msk.f32.vlgmr.msra.gmra.mrb[14].mxu1 %vm285_vm4, %v800_v20 }
 0xa2b   :  { %2956 = vmatprep.mubr.msk.f32.mxu1 %vm3364_vm3, %v3363_v12 }
 0xaf9   :  { %v794_v21 = vpop.f32.mrb[12].mxu1 }
 0xafa   :  { %798 = vst.msk [vmem:[#allocation2 + $0x8] sm:$0xff] %vm285_vm4, %v794_v21  ;;  %v2948_v22 = vpop.f32.mrb[13].mxu1 }
 0xafd   :  { %v873_v23 = vpop.f32.mrb[14].mxu1 }
 0xafe   :  { %v877_v25 = vmul.f32 0.25, %v873_v23  ;;  %v2953_v26 = vpop.f32.mrb[15].mxu1 }
 0xaff   :  { %v1098_v26 = vsub.s32 5, %v3515_v61 }
 0xb00   :  { %v878_v27 = vadd.f32 %v877_v25, %v3597_v60  ;;  %v1092_v25 = vsub.s32 4, %v3515_v61 }
 0xb02   :  { %v879_v29 = vsel %vm366_vm5, %v878_v27, -inf }
 0xb03   :  { %880 = vmax.xlane.f32.xlu0 %v879_v29 }
 0xb19   :  { %890 = vrot.lane.b32.xlu0 %v3546_v16, %s3369_s14 }
 0xb90   :  { %v881_v30 = vpop.xlane.xlu0 %880 }
 0xb91   :  { %v882_v31 = vsub.f32 %v878_v27, %v881_v30  ;;  %v1093_v27 = vrot.slane %v3542_v13, %v1092_v25 }
 0xb93   :  { %v883_v32 = vmul.f32 1.442695, %v882_v31  ;;  %v1099_v31 = vrot.slane %v3542_v13, %v1098_v26 }
 0xb94   :  { %v891_v33 = vpop.permute.xlu0 %890 }
 0xb95   :  { %3259 = vpow2.f32 %v883_v32  ;;  %2955 = vmatpush3.msra.mxu1 %v891_v33 }
 0xb9f   :  { %v3260_v34 = vpop.eup %3259 }
 0xba0   :  { %v885_v35 = vsel %vm366_vm5, %v3260_v34, 0.0 }
 0xba1   :  { %886 = vadd.xlane.f32.xlu1 %v885_v35 }
 0xbb2   :  { %623 = vrot.lane.b32.xlu1 %v618_v58, %s3370_s15 }
 0xc2e   :  { %v887_v36 = vpop.xlane.xlu1 %886 }
 0xc2f   :  { %3261 = vrcp.f32 %v887_v36 }
 0xc32   :  { %v624_v37 = vpop.permute.xlu1 %623 }
 0xc33   :  { %627 = vst.msk [vmem:[#allocation2] sm:$0xff] %vm626_vm6, %v624_v37 }
 0xc39   :  { %v3262_v16 = vpop.eup %3261 }
 0xc3a   :  { %v889_v38 = vmul.f32 %v3262_v16, %v3260_v34  ;;  %v971_v39 = vld [vmem:[#allocation2] sm:$0xff] }
 0xc3b   :  { %2967 = vmatprep.mubr.msk.f32.mxu0 %vm149_vm2, %v971_v39  ;;  %v1209_v16 = vld [vmem:[%s3976_s7] sm:$0xff] }
 0xc3c   :  { %2957 = vmatmul.mubr.msk.f32.vlgmr.msra.gmra.mrb[16].mxu1 %vm366_vm5, %v889_v38  ;;  %v1210_v38 = vld [vmem:[%s3976_s7 + $0x8] sm:$0xff] }
 0xc3d   :  { %v3159_v39 = vpack.c.bf16 %v1210_v38, %v1209_v16 }
 0xc3f   :  { %3160 = vmatprep.subr.bf16.mxu0 %v3159_v39 }
 0xd0f   :  { %v962_v46 = vpop.f32.mrb[16].mxu1 }
 0xd10   :  { %967 = vrot.lane.b32.xlu0 %v962_v46, %s3370_s15  ;;  %v2958_v47 = vpop.f32.mrb[17].mxu1  ;;  %v1215_v46 = vld [vmem:[%s3976_s7 + $0x30] sm:$0xff] }
 0xd11   :  { %v1216_v47 = vld [vmem:[%s3976_s7 + $0x38] sm:$0xff] }
 0xd82   :  { %v968_v48 = vpop.permute.xlu0 %967 }
 0xd83   :  { %970 = vst.msk [vmem:[#allocation2 + $0x8] sm:$0xff] %vm626_vm6, %v968_v48  ;;  %v3171_v48 = vpack.c.bf16 %v1216_v47, %v1215_v46 }
 0xd8a   :  { %v972_v49 = vld [vmem:[#allocation2 + $0x8] sm:$0xff] }
 0xd8b   :  { %2968 = vmatmul.mubr.msk.f32.vlgmr.msra.gmra.mrb[2].mxu0 %vm149_vm2, %v972_v49  ;;  %v1108_v49 = vsub.s32 2, %v3515_v61 }
 0xd8c   :  { %3162 = vmatpush3.bf16.msra.mxu0 %v3159_v39 }
 0xd8d   :  { %3164 = vmatprep.subr.bf16.mxu0 %v3163_v42 }
 0xd90   :  { %3166 = vmatpush3.bf16.msra.mxu0 %v3163_v42  ;;  %v2718_v42 = vld [vmem:[%s3973_s4 + $0x30] sm:$0xff] }
 0xd91   :  { %3168 = vmatprep.subr.bf16.mxu0 %v3167_v45  ;;  %v3179_v44 = vpack.c.bf16 %v2719_v43, %v2718_v42 }
 0xd94   :  { %3170 = vmatpush3.bf16.msra.mxu0 %v3167_v45 }
 0xd95   :  { %3172 = vmatprep.subr.bf16.mxu0 %v3171_v48 }
 0xd98   :  { %3174 = vmatpush3.bf16.msra.mxu0 %v3171_v48 }
 0xd99   :  { %3021 = vmatprep.subr.mxu0 %v3363_v12 }
 0xe5e   :  { %v2969_v51 = vpop.f32.mrb[2].mxu0 }
 0xe5f   :  { %v1059_v52 = vadd.f32 %v2969_v51, %v980_v50  ;;  %v1053_v53 = vpop.f32.mrb[3].mxu0 }
 0xe60   :  { %v1054_v54 = vadd.f32 %v1053_v53, %v980_v50  ;;  %v1109_v50 = vrot.slane %v3542_v13, %v1108_v49 }
 0xe61   :  { %v1063_v55 = vadd.f32 %v1059_v52, %v3532_v11 }
 0xe62   :  { %v1062_v56 = vadd.f32 %v1054_v54, %v3528_v9  ;;  %v1102_v9 = vld [vmem:[%s3975_s6] sm:$0xff] }
 0xe63   :  { %v1067_v57 = vsel %vm149_vm2, %v1063_v55, 0.0  ;;  %v3151_v10 = vpack.c.bf16 %v1103_v8, %v1102_v9 }
 0xe64   :  { %1068 = vadd.xlane.f32.xlu1 %v1067_v57  ;;  %v1064_v58 = vsel %vm149_vm2, %v1062_v56, 0.0 }
 0xe65   :  { %1065 = vadd.xlane.f32.xlu0 %v1064_v58  ;;  %3152 = vmatprep.subr.bf16.mxu1 %v3151_v10 }
 0xe66   :  { %3154 = vmatpush3.bf16.msra.mxu1 %v3151_v10 }
 0xe67   :  { %3156 = vmatprep.subr.bf16.mxu1 %v3155_v17 }
 0xe6a   :  { %3158 = vmatpush3.bf16.msra.mxu1 %v3155_v17  ;;  %v1220_v17 = vrot.slane %v3542_v13, %v1219_v15 }
 0xef1   :  { %v1069_v59 = vpop.xlane.xlu1 %1068 }
 0xef2   :  { %v1071_v62 = vmul.f32 0.03125, %v1069_v59  ;;  %v1066_v0 = vpop.xlane.xlu0 %1065 }
 0xef3   :  { %v1070_v2 = vmul.f32 0.03125, %v1066_v0 }
 0xef4   :  { %v1073_v3 = vsub.f32 %v1063_v55, %v1071_v62 }
 0xef5   :  { %v1072_v4 = vsub.f32 %v1062_v56, %v1070_v2 }
 0xef6   :  { %v1075_v7 = vmul.f32 %v1073_v3, %v1073_v3 }
 0xef7   :  { %v1074_v5 = vmul.f32 %v1072_v4, %v1072_v4 }
 0xef8   :  { %v1079_v11 = vsel %vm149_vm2, %v1075_v7, 0.0 }
 0xef9   :  { %v1076_v6 = vsel %vm149_vm2, %v1074_v5, 0.0 }
 0xefa   :  { %1077 = vadd.xlane.f32.xlu0 %v1076_v6 }
 0xefe   :  { %1080 = vadd.xlane.f32.xlu0 %v1079_v11 }
 0xf87   :  { %v1078_v18 = vpop.xlane.xlu0 %1077 }
 0xf88   :  { %v1082_v19 = vmul.f32 0.03125, %v1078_v18 }
 0xf8a   :  { %v1084_v20 = vadd.f32 1e-12, %v1082_v19 }
 0xf8b   :  { %v1081_v21 = vpop.xlane.xlu0 %1080 }
 0xf8c   :  { %3263 = vrsqrt.f32 %v1084_v20  ;;  %v1083_v22 = vmul.f32 0.03125, %v1081_v21 }
 0xf8e   :  { %v1085_v23 = vadd.f32 1e-12, %v1083_v22 }
 0xf90   :  { %3265 = vrsqrt.f32 %v1085_v23 }
 0xf96   :  { %v3264_v29 = vpop.eup %3263 }
 0xf97   :  { %v1088_v30 = vmul.f32 %v3264_v29, %v1072_v4 }
 0xf99   :  { %v1094_v32 = vmul.f32 %v1093_v27, %v1088_v30 }
 0xf9a   :  { %v3266_v33 = vpop.eup %3265 }
 0xf9b   :  { %v1089_v34 = vmul.f32 %v3266_v33, %v1073_v3  ;;  %v3670_v35 = vadd.f32 %v1099_v31, %v1094_v32 }
 0xf9d   :  { %v1095_v36 = vmul.f32 %v1093_v27, %v1089_v34  ;;  %2978 = vmatprep.mubr.msk.f32.mxu1 %vm149_vm2, %v3670_v35 }
 0xf9f   :  { %v1101_v37 = vadd.f32 %v1099_v31, %v1095_v36 }
 0xfa1   :  { %2979 = vmatmul.mubr.msk.f32.vlgmr.msra.gmra.mrb[18].mxu1 %vm149_vm2, %v1101_v37 }
0x1074   :  { %v2980_v51 = vpop.f32.mrb[18].mxu1 }
0x1075   :  { %v1188_v52 = vadd.f32 %v2980_v51, %v1109_v50  ;;  %v1182_v53 = vpop.f32.mrb[19].mxu1 }
0x1076   :  { %v1183_v54 = vadd.f32 %v1182_v53, %v1109_v50  ;;  %v1339_v53 = vsub.s32 7, %v3515_v61 }
0x1077   :  { %v1194_v55 = vmul.f32 0.044715, %v1188_v52  ;;  %v1192_v8 = vmul.f32 0.5, %v1188_v52 }
0x1078   :  { %v1193_v56 = vmul.f32 0.044715, %v1183_v54  ;;  %v1191_v11 = vmul.f32 0.5, %v1183_v54 }
0x1079   :  { %v1196_v57 = vmul.f32 %v1194_v55, %v1188_v52 }
0x107a   :  { %v1195_v58 = vmul.f32 %v1193_v56, %v1183_v54 }
0x107b   :  { %v1198_v59 = vmul.f32 %v1196_v57, %v1188_v52 }
0x107c   :  { %v1197_v62 = vmul.f32 %v1195_v58, %v1183_v54 }
0x107d   :  { %v1200_v0 = vadd.f32 %v1198_v59, %v1188_v52  ;;  %v1333_v52 = vsub.s32 6, %v3515_v61  ;;  %v1340_v59 = vrot.slane %v3542_v13, %v1339_v53 }
0x107e   :  { %v1199_v2 = vadd.f32 %v1197_v62, %v1183_v54 }
0x107f   :  { %v1202_v3 = vmul.f32 0.7978846, %v1200_v0  ;;  %v1334_v54 = vrot.slane %v3542_v13, %v1333_v52 }
0x1080   :  { %v1201_v4 = vmul.f32 0.7978846, %v1199_v2 }
0x1081   :  { %3267 = vtanh.f32 %v1202_v3 }
0x1082   :  { %3269 = vtanh.f32 %v1201_v4  ;;  %v3751_v4 = vld [vmem:[%s3977_s8 + $0x8] sm:$0xff] }
0x1083   :  { %v1353_v13 = vrot.slane %v3751_v4, %v3518_v63 }
0x108b   :  { %v3268_v5 = vpop.eup %3267 }
0x108c   :  { %v3270_v6 = vpop.eup %3269  ;;  %v1206_v7 = vadd.f32 1.0, %v3268_v5 }
0x108d   :  { %v1205_v9 = vadd.f32 1.0, %v3270_v6 }
0x108e   :  { %v1208_v14 = vmul.f32 %v1206_v7, %v1192_v8 }
0x108f   :  { %v1207_v10 = vmul.f32 %v1205_v9, %v1191_v11 }
0x1091   :  { %2997 = vmatprep.mubr.msk.f32.mxu0 %vm1221_vm7, %v1207_v10 }
0x1092   :  { %2998 = vmatmul.mubr.msk.f32.vlgmr.msra.gmra.mrb[4].mxu0 %vm1221_vm7, %v1208_v14 }
0x1093   :  { %3023 = vmatprep.mubr.msk.f32.mxu0 %vm3364_vm3, %v3363_v12 }
0x1165   :  { %v2999_v18 = vpop.f32.mrb[4].mxu0 }
0x1166   :  { %v1300_v19 = vadd.f32 %v2999_v18, %v1220_v17  ;;  %v1294_v20 = vpop.f32.mrb[5].mxu0 }
0x1167   :  { %v1295_v21 = vadd.f32 %v1294_v20, %v1220_v17 }
0x1168   :  { %v1304_v22 = vadd.f32 %v1300_v19, %v1101_v37 }
0x1169   :  { %v1303_v23 = vadd.f32 %v1295_v21, %v3670_v35  ;;  %v2716_v35 = vld [vmem:[%s3973_s4 + $0x20] sm:$0xff] }
0x116a   :  { %v1308_v27 = vsel %vm149_vm2, %v1304_v22, 0.0  ;;  %v3175_v41 = vpack.c.bf16 %v2717_v40, %v2716_v35 }
0x116b   :  { %1309 = vadd.xlane.f32.xlu1 %v1308_v27  ;;  %v1305_v29 = vsel %vm149_vm2, %v1303_v23, 0.0 }
0x116c   :  { %1306 = vadd.xlane.f32.xlu0 %v1305_v29  ;;  %3176 = vmatprep.subr.bf16.mxu1 %v3175_v41 }
0x116d   :  { %3178 = vmatpush3.bf16.msra.mxu1 %v3175_v41 }
0x116e   :  { %3180 = vmatprep.subr.bf16.mxu1 %v3179_v44 }
0x1171   :  { %3182 = vmatpush3.bf16.msra.mxu1 %v3179_v44 }
0x1172   :  { %3011 = vmatprep.subr.mxu1 %v3363_v12 }
0x11f8   :  { %v1310_v30 = vpop.xlane.xlu1 %1309 }
0x11f9   :  { %v1312_v31 = vmul.f32 0.03125, %v1310_v30  ;;  %v1307_v32 = vpop.xlane.xlu0 %1306 }
0x11fa   :  { %v1311_v33 = vmul.f32 0.03125, %v1307_v32 }
0x11fb   :  { %v1314_v34 = vsub.f32 %v1304_v22, %v1312_v31 }
0x11fc   :  { %v1313_v36 = vsub.f32 %v1303_v23, %v1311_v33 }
0x11fd   :  { %v1316_v16 = vmul.f32 %v1314_v34, %v1314_v34 }
0x11fe   :  { %v1315_v38 = vmul.f32 %v1313_v36, %v1313_v36 }
0x11ff   :  { %v1320_v39 = vsel %vm149_vm2, %v1316_v16, 0.0 }
0x1200   :  { %1321 = vadd.xlane.f32.xlu1 %v1320_v39  ;;  %v1317_v37 = vsel %vm149_vm2, %v1315_v38, 0.0 }
0x1201   :  { %1318 = vadd.xlane.f32.xlu0 %v1317_v37 }
0x128d   :  { %v1322_v45 = vpop.xlane.xlu1 %1321 }
0x128e   :  { %v1324_v46 = vmul.f32 0.03125, %v1322_v45  ;;  %v1319_v47 = vpop.xlane.xlu0 %1318 }
0x128f   :  { %v1323_v48 = vmul.f32 0.03125, %v1319_v47 }
0x1290   :  { %v1326_v50 = vadd.f32 1e-12, %v1324_v46 }
0x1291   :  { %v1325_v51 = vadd.f32 1e-12, %v1323_v48 }
0x1292   :  { %3271 = vrsqrt.f32 %v1326_v50 }
0x1293   :  { %3273 = vrsqrt.f32 %v1325_v51 }
0x129c   :  { %v3272_v55 = vpop.eup %3271 }
0x129d   :  { %v3274_v56 = vpop.eup %3273  ;;  %v1330_v57 = vmul.f32 %v3272_v55, %v1314_v34 }
0x129e   :  { %v1329_v58 = vmul.f32 %v3274_v56, %v1313_v36 }
0x129f   :  { %v1336_v62 = vmul.f32 %v1334_v54, %v1330_v57 }
0x12a0   :  { %v1335_v0 = vmul.f32 %v1334_v54, %v1329_v58 }
0x12a1   :  { %v3740_v3 = vadd.f32 %v1340_v59, %v1336_v62 }
0x12a2   :  { %v3738_v2 = vadd.f32 %v1340_v59, %v1335_v0 }
0x12a4   :  { %3008 = vmatprep.mubr.msk.f32.mxu1 %vm149_vm2, %v3738_v2 }
0x12a5   :  { %3009 = vmatmul.mubr.msk.f32.vlgmr.msra.gmra.mrb[20].mxu1 %vm149_vm2, %v3740_v3 }
0x12a6   :  { %3013 = vmatprep.mubr.msk.f32.mxu1 %vm3364_vm3, %v3363_v12 }
0x1378   :  { %v3010_v5 = vpop.f32.mrb[20].mxu1 }
0x1379   :  { %v1426_v6 = vpop.f32.mrb[21].mxu1  ;;  %v3761_v11 = vadd.f32 %v3010_v5, %v1353_v13 }
0x137a   :  { %v3755_v7 = vadd.f32 %v1426_v6, %v1353_v13 }
0x137c   :  { %1604 = vrot.lane.b32.xlu1 %v3755_v7, %s3368_s1  ;;  %1436 = vrot.lane.b32.xlu0 %v3755_v7, %s3366_s29 }
0x1380   :  { %1602 = vrot.lane.b32.xlu1 %v3755_v7, %s3367_s13  ;;  %1775 = vrot.lane.b32.xlu0 %v3761_v11, %s3366_s29 }
0x1384   :  { %1943 = vrot.lane.b32.xlu1 %v3761_v11, %s3368_s1  ;;  %1941 = vrot.lane.b32.xlu0 %v3761_v11, %s3367_s13 }
0x13ee   :  { %v1605_v63 = vpop.permute.xlu1 %1604  ;;  %v1437_v9 = vpop.permute.xlu0 %1436 }
0x13ef   :  { %3012 = vmatpush3.xpose.msk.msra.mxu1 %vm285_vm4, %v1437_v9  ;;  %3022 = vmatpush3.xpose.msk.msra.mxu0 %vm285_vm4, %v1605_v63 }
0x13f0   :  { %3031 = vmatprep.subr.mxu0 %v3363_v12  ;;  %3016 = vmatprep.subr.mxu1 %v3363_v12 }
0x13f2   :  { %v1603_v8 = vpop.permute.xlu1 %1602  ;;  %3014 = vmatmul.mubr.msk.f32.vlgmr.msra.gmra.mrb[22].mxu1 %vm285_vm4, %v3755_v7  ;;  %v1776_v10 = vpop.permute.xlu0 %1775 }
0x13f3   :  { %3024 = vmatmul.mubr.msk.f32.vlgmr.msra.gmra.mrb[6].mxu0 %vm285_vm4, %v1603_v8  ;;  %3018 = vmatprep.mubr.msk.f32.mxu1 %vm3364_vm3, %v3363_v12 }
0x13f4   :  { %3032 = vmatpush3.xpose.msk.msra.mxu0 %vm285_vm4, %v1776_v10  ;;  %3033 = vmatprep.mubr.msk.f32.mxu0 %vm3364_vm3, %v3363_v12 }
0x13f5   :  { %3041 = vmatprep.subr.mxu0 %v3363_v12 }
0x13f6   :  { %v1944_v14 = vpop.permute.xlu1 %1943  ;;  %v1942_v17 = vpop.permute.xlu0 %1941 }
0x13f7   :  { %3034 = vmatmul.mubr.msk.f32.vlgmr.msra.gmra.mrb[8].mxu0 %vm285_vm4, %v3761_v11 }
0x13f8   :  { %3042 = vmatpush3.xpose.msk.msra.mxu0 %vm285_vm4, %v1944_v14  ;;  %3043 = vmatprep.mubr.msk.f32.mxu0 %vm3364_vm3, %v3363_v12 }
0x13fb   :  { %3044 = vmatmul.mubr.msk.f32.vlgmr.msra.gmra.mrb[10].mxu0 %vm285_vm4, %v1942_v17 }
0x14c5   :  { %v1508_v18 = vpop.f32.mrb[22].mxu1 }
0x14c6   :  { %v1512_v19 = vmul.f32 0.25, %v1508_v18  ;;  %v3015_v20 = vpop.f32.mrb[23].mxu1  ;;  %v1676_v21 = vpop.f32.mrb[6].mxu0 }
0x14c7   :  { %v1680_v22 = vmul.f32 0.25, %v1676_v21  ;;  %v3025_v23 = vpop.f32.mrb[7].mxu0 }
0x14c8   :  { %v1513_v27 = vadd.f32 %v1512_v19, %v3563_v24 }
0x14c9   :  { %v1681_v29 = vadd.f32 %v1680_v22, %v3563_v24 }
0x14ca   :  { %v1847_v30 = vpop.f32.mrb[8].mxu0  ;;  %v1514_v31 = vsel %vm366_vm5, %v1513_v27, -inf }
0x14cb   :  { %v1851_v32 = vmul.f32 0.25, %v1847_v30  ;;  %1515 = vmax.xlane.f32.xlu1 %v1514_v31  ;;  %v3035_v33 = vpop.f32.mrb[9].mxu0  ;;  %v1682_v34 = vsel %vm366_vm5, %v1681_v29, -inf  ;;  %v2734_v31 = vld [vmem:[%s3974_s5 + $0x20] sm:$0xff] }
0x14cc   :  { %1683 = vmax.xlane.f32.xlu0 %v1682_v34  ;;  %v2736_v34 = vld [vmem:[%s3974_s5 + $0x30] sm:$0xff] }
0x14cd   :  { %v1852_v36 = vadd.f32 %v1851_v32, %v3597_v60  ;;  %v2735_v32 = vld [vmem:[%s3974_s5 + $0x28] sm:$0xff] }
0x14ce   :  { %v2015_v16 = vpop.f32.mrb[10].mxu0  ;;  %v3183_v33 = vpack.c.bf16 %v2735_v32, %v2734_v31  ;;  %v2747_v32 = vld [vmem:[%s3976_s7 + $0x48] sm:$0xff] }
0x14cf   :  { %v2019_v38 = vmul.f32 0.25, %v2015_v16  ;;  %v3045_v39 = vpop.f32.mrb[11].mxu0  ;;  %v1853_v37 = vsel %vm366_vm5, %v1852_v36, -inf }
0x14d0   :  { %1854 = vmax.xlane.f32.xlu0 %v1853_v37  ;;  %3184 = vmatprep.subr.bf16.mxu0 %v3183_v33 }
0x14d1   :  { %v2020_v35 = vadd.f32 %v2019_v38, %v3597_v60  ;;  %3186 = vmatpush3.bf16.msra.mxu0 %v3183_v33 }
0x14d3   :  { %v2021_v24 = vsel %vm366_vm5, %v2020_v35, -inf }
0x14d4   :  { %2022 = vmax.xlane.f32.xlu1 %v2021_v24 }
0x14e5   :  { %1693 = vrot.lane.b32.xlu1 %v3755_v7, %s3369_s14 }
0x1558   :  { %v1516_v40 = vpop.xlane.xlu1 %1515 }
0x1559   :  { %v1517_v41 = vsub.f32 %v1513_v27, %v1516_v40  ;;  %v1684_v42 = vpop.xlane.xlu0 %1683 }
0x155a   :  { %v1685_v43 = vsub.f32 %v1681_v29, %v1684_v42 }
0x155b   :  { %v1518_v44 = vmul.f32 1.442695, %v1517_v41 }
0x155c   :  { %v1686_v45 = vmul.f32 1.442695, %v1685_v43  ;;  %v2123_v43 = vrot.slane %v3751_v4, %v3524_v1 }
0x155d   :  { %3275 = vpow2.f32 %v1518_v44  ;;  %v1855_v57 = vpop.xlane.xlu0 %1854 }
0x155e   :  { %3277 = vpow2.f32 %v1686_v45  ;;  %v1856_v58 = vsub.f32 %v1852_v36, %v1855_v57  ;;  %v2737_v36 = vld [vmem:[%s3974_s5 + $0x38] sm:$0xff] }
0x155f   :  { %v3187_v16 = vpack.c.bf16 %v2737_v36, %v2736_v34  ;;  %v2749_v34 = vld [vmem:[%s3976_s7 + $0x58] sm:$0xff] }
0x1560   :  { %v1857_v59 = vmul.f32 1.442695, %v1856_v58 }
0x1561   :  { %v2023_v46 = vpop.xlane.xlu1 %2022  ;;  %3188 = vmatprep.subr.bf16.mxu0 %v3187_v16 }
0x1562   :  { %v2024_v47 = vsub.f32 %v2020_v35, %v2023_v46  ;;  %3190 = vmatpush3.bf16.msra.mxu0 %v3187_v16  ;;  %v2750_v16 = vld [vmem:[%s3976_s7 + $0x60] sm:$0xff] }
0x1564   :  { %v2025_v48 = vmul.f32 1.442695, %v2024_v47 }
0x1565   :  { %v1694_v13 = vpop.permute.xlu1 %1693 }
0x1566   :  { %3279 = vpow2.f32 %v2025_v48 }
0x1567   :  { %v3276_v50 = vpop.eup %3275  ;;  %3281 = vpow2.f32 %v1857_v59 }
0x1568   :  { %v3278_v60 = vpop.eup %3277  ;;  %v1520_v51 = vsel %vm366_vm5, %v3276_v50, 0.0 }
0x1569   :  { %1521 = vadd.xlane.f32.xlu0 %v1520_v51  ;;  %v1688_v54 = vsel %vm366_vm5, %v3278_v60, 0.0 }
0x156a   :  { %1689 = vadd.xlane.f32.xlu1 %v1688_v54 }
0x1570   :  { %v3280_v55 = vpop.eup %3279 }
0x1571   :  { %v2027_v56 = vsel %vm366_vm5, %v3280_v55, 0.0  ;;  %v3282_v62 = vpop.eup %3281 }
0x1572   :  { %2028 = vadd.xlane.f32.xlu1 %v2027_v56  ;;  %v1859_v0 = vsel %vm366_vm5, %v3282_v62, 0.0 }
0x157f   :  { %1525 = vrot.lane.b32.xlu0 %v3755_v7, %s3365_s28 }
0x1583   :  { %1864 = vrot.lane.b32.xlu1 %v3761_v11, %s3365_s28 }
0x159e   :  { %1860 = vadd.xlane.f32.xlu0 %v1859_v0 }
0x15b4   :  { %2032 = vrot.lane.b32.xlu0 %v3761_v11, %s3369_s14 }
0x15f6   :  { %v1522_v5 = vpop.xlane.xlu0 %1521 }
0x15f7   :  { %3283 = vrcp.f32 %v1522_v5  ;;  %v1690_v6 = vpop.xlane.xlu1 %1689 }
0x15f8   :  { %3285 = vrcp.f32 %v1690_v6  ;;  %v2742_v6 = vld [vmem:[%s3975_s6 + $0x30] sm:$0xff] }
0x15fa   :  { %v1526_v7 = vpop.permute.xlu0 %1525 }
0x15fb   :  { %3017 = vmatpush3.msra.mxu1 %v1526_v7  ;;  %v2743_v7 = vld [vmem:[%s3975_s6 + $0x38] sm:$0xff] }
0x15fc   :  { %3026 = vmatprep.subr.mxu1 %v3363_v12 }
0x15ff   :  { %v2029_v8 = vpop.xlane.xlu1 %2028 }
0x1601   :  { %v3284_v63 = vpop.eup %3283 }
0x1602   :  { %v1524_v9 = vmul.f32 %v3284_v63, %v3276_v50  ;;  %v3286_v10 = vpop.eup %3285  ;;  %v3195_v63 = vpack.c.bf16 %v2743_v7, %v2742_v6 }
0x1603   :  { %v1692_v11 = vmul.f32 %v3286_v10, %v3278_v60  ;;  %v1865_v14 = vpop.permute.xlu1 %1864 }
0x1604   :  { %3019 = vmatmul.mubr.msk.f32.vlgmr.msra.gmra.mrb[24].mxu1 %vm366_vm5, %v1524_v9 }
0x1605   :  { %3027 = vmatpush3.msra.mxu1 %v1694_v13  ;;  %3028 = vmatprep.mubr.msk.f32.mxu1 %vm3364_vm3, %v3363_v12  ;;  %v2741_v13 = vld [vmem:[%s3975_s6 + $0x28] sm:$0xff] }
0x1606   :  { %3036 = vmatprep.subr.mxu1 %v3363_v12 }
0x1608   :  { %3029 = vmatmul.mubr.msk.f32.vlgmr.msra.gmra.mrb[26].mxu1 %vm366_vm5, %v1692_v11 }
0x1609   :  { %3037 = vmatpush3.msra.mxu1 %v1865_v14  ;;  %3038 = vmatprep.mubr.msk.f32.mxu1 %vm3364_vm3, %v3363_v12 }
0x160a   :  { %3046 = vmatprep.subr.mxu1 %v3363_v12 }
0x162b   :  { %v1861_v17 = vpop.xlane.xlu0 %1860 }
0x162c   :  { %3287 = vrcp.f32 %v1861_v17 }
0x162d   :  { %3289 = vrcp.f32 %v2029_v8 }
0x162f   :  { %v2033_v21 = vpop.permute.xlu0 %2032 }
0x1636   :  { %v3288_v18 = vpop.eup %3287 }
0x1637   :  { %v1863_v19 = vmul.f32 %v3288_v18, %v3282_v62  ;;  %v3290_v20 = vpop.eup %3289  ;;  %v2236_v18 = vrot.slane %v3751_v4, %v1092_v25  ;;  %v2746_v25 = vld [vmem:[%s3976_s7 + $0x40] sm:$0xff] }
0x1638   :  { %v2031_v22 = vmul.f32 %v3290_v20, %v3280_v55  ;;  %v3199_v33 = vpack.c.bf16 %v2747_v32, %v2746_v25  ;;  %v2490_v25 = vld [vmem:[%s3978_s9 + $0x18] sm:$0xff] }
0x1639   :  { %3039 = vmatmul.mubr.msk.f32.vlgmr.msra.gmra.mrb[28].mxu1 %vm366_vm5, %v1863_v19 }
0x163a   :  { %3047 = vmatpush3.msra.mxu1 %v2033_v21  ;;  %3048 = vmatprep.mubr.msk.f32.mxu1 %vm3364_vm3, %v3363_v12 }
0x163b   :  { %3200 = vmatprep.subr.bf16.mxu0 %v3199_v33 }
0x163d   :  { %3049 = vmatmul.mubr.msk.f32.vlgmr.msra.gmra.mrb[30].mxu1 %vm366_vm5, %v2031_v22 }
0x16d7   :  { %v1597_v23 = vpop.f32.mrb[24].mxu1 }
0x16d8   :  { %1601 = vst.msk [vmem:[#allocation2] sm:$0xff] %vm285_vm4, %v1597_v23  ;;  %v3020_v27 = vpop.f32.mrb[25].mxu1  ;;  %v2242_v23 = vrot.slane %v3751_v4, %v1098_v26  ;;  %v2748_v26 = vld [vmem:[%s3976_s7 + $0x50] sm:$0xff] }
0x16d9   :  { %v3203_v36 = vpack.c.bf16 %v2749_v34, %v2748_v26 }
0x16db   :  { %v1765_v29 = vpop.f32.mrb[26].mxu1 }
0x16dc   :  { %1770 = vrot.lane.b32.xlu1 %v1765_v29, %s3370_s15  ;;  %v3030_v30 = vpop.f32.mrb[27].mxu1 }
0x170c   :  { %v1936_v38 = vpop.f32.mrb[28].mxu1 }
0x170d   :  { %1940 = vst.msk [vmem:[#allocation2 + $0x8] sm:$0xff] %vm285_vm4, %v1936_v38  ;;  %v3040_v39 = vpop.f32.mrb[29].mxu1  ;;  %v2751_v38 = vld [vmem:[%s3976_s7 + $0x68] sm:$0xff] }
0x170e   :  { %v3207_v39 = vpack.c.bf16 %v2751_v38, %v2750_v16 }
0x1710   :  { %v2104_v37 = vpop.f32.mrb[30].mxu1 }
0x1711   :  { %2109 = vrot.lane.b32.xlu0 %v2104_v37, %s3370_s15  ;;  %v3050_v35 = vpop.f32.mrb[31].mxu1  ;;  %v2752_v37 = vld [vmem:[%s3976_s7 + $0x70] sm:$0xff] }
0x1712   :  { %v2753_v35 = vld [vmem:[%s3976_s7 + $0x78] sm:$0xff] }
0x174e   :  { %v1771_v24 = vpop.permute.xlu1 %1770 }
0x174f   :  { %1773 = vst.msk [vmem:[#allocation2] sm:$0xff] %vm626_vm6, %v1771_v24  ;;  %v3211_v24 = vpack.c.bf16 %v2753_v35, %v2752_v37 }
0x1756   :  { %v2113_v40 = vld [vmem:[#allocation2] sm:$0xff] }
0x1757   :  { %3059 = vmatprep.mubr.msk.f32.mxu0 %vm149_vm2, %v2113_v40  ;;  %v2253_v40 = vrot.slane %v3751_v4, %v1108_v49 }
0x1783   :  { %v2110_v41 = vpop.permute.xlu0 %2109 }
0x1784   :  { %2112 = vst.msk [vmem:[#allocation2 + $0x8] sm:$0xff] %vm626_vm6, %v2110_v41 }
0x178b   :  { %v2114_v42 = vld [vmem:[#allocation2 + $0x8] sm:$0xff] }
0x178c   :  { %3060 = vmatmul.mubr.msk.f32.vlgmr.msra.gmra.mrb[12].mxu0 %vm149_vm2, %v2114_v42 }
0x178d   :  { %3202 = vmatpush3.bf16.msra.mxu0 %v3199_v33 }
0x178e   :  { %3204 = vmatprep.subr.bf16.mxu0 %v3203_v36 }
0x1791   :  { %3206 = vmatpush3.bf16.msra.mxu0 %v3203_v36 }
0x1792   :  { %3208 = vmatprep.subr.bf16.mxu0 %v3207_v39 }
0x1795   :  { %3210 = vmatpush3.bf16.msra.mxu0 %v3207_v39  ;;  %v2478_v39 = vrot.slane %v3751_v4, %v1333_v52  ;;  %v2756_v52 = vld [vmem:[%s3978_s9 + $0x20] ss:$0 sm:$0xff] }
0x1796   :  { %3212 = vmatprep.subr.bf16.mxu0 %v3211_v24 }
0x1799   :  { %3214 = vmatpush3.bf16.msra.mxu0 %v3211_v24 }
0x185f   :  { %v3061_v44 = vpop.f32.mrb[12].mxu0 }
0x1860   :  { %v2202_v45 = vadd.f32 %v3061_v44, %v2123_v43  ;;  %v2196_v46 = vpop.f32.mrb[13].mxu0 }
0x1861   :  { %v2197_v47 = vadd.f32 %v2196_v46, %v2123_v43 }
0x1862   :  { %v2206_v48 = vadd.f32 %v2202_v45, %v3740_v3 }
0x1863   :  { %v2205_v50 = vadd.f32 %v2197_v47, %v3738_v2  ;;  %v2740_v2 = vld [vmem:[%s3975_s6 + $0x20] sm:$0xff] }
0x1864   :  { %v2210_v60 = vsel %vm149_vm2, %v2206_v48, 0.0  ;;  %v3191_v5 = vpack.c.bf16 %v2741_v13, %v2740_v2  ;;  %v2365_v2 = vrot.slane %v3751_v4, %v1219_v15 }
0x1865   :  { %2211 = vadd.xlane.f32.xlu0 %v2210_v60  ;;  %v2207_v51 = vsel %vm149_vm2, %v2205_v50, 0.0 }
0x1866   :  { %2208 = vadd.xlane.f32.xlu1 %v2207_v51  ;;  %3192 = vmatprep.subr.bf16.mxu1 %v3191_v5 }
0x1867   :  { %3194 = vmatpush3.bf16.msra.mxu1 %v3191_v5 }
0x1868   :  { %3196 = vmatprep.subr.bf16.mxu1 %v3195_v63 }
0x186b   :  { %3198 = vmatpush3.bf16.msra.mxu1 %v3195_v63 }
0x18f2   :  { %v2212_v54 = vpop.xlane.xlu0 %2211 }
0x18f3   :  { %v2214_v55 = vmul.f32 0.03125, %v2212_v54  ;;  %v2209_v56 = vpop.xlane.xlu1 %2208 }
0x18f4   :  { %v2213_v57 = vmul.f32 0.03125, %v2209_v56 }
0x18f5   :  { %v2216_v58 = vsub.f32 %v2206_v48, %v2214_v55 }
0x18f6   :  { %v2215_v1 = vsub.f32 %v2205_v50, %v2213_v57 }
0x18f7   :  { %v2218_v59 = vmul.f32 %v2216_v58, %v2216_v58 }
0x18f8   :  { %v2217_v62 = vmul.f32 %v2215_v1, %v2215_v1 }
0x18f9   :  { %v2222_v0 = vsel %vm149_vm2, %v2218_v59, 0.0 }
0x18fa   :  { %2223 = vadd.xlane.f32.xlu1 %v2222_v0  ;;  %v2219_v3 = vsel %vm149_vm2, %v2217_v62, 0.0 }
0x18fb   :  { %2220 = vadd.xlane.f32.xlu0 %v2219_v3 }
0x1987   :  { %v2224_v9 = vpop.xlane.xlu1 %2223 }
0x1988   :  { %v2226_v8 = vmul.f32 0.03125, %v2224_v9  ;;  %v2221_v10 = vpop.xlane.xlu0 %2220 }
0x1989   :  { %v2225_v11 = vmul.f32 0.03125, %v2221_v10 }
0x198a   :  { %v2228_v14 = vadd.f32 1e-12, %v2226_v8 }
0x198b   :  { %v2227_v17 = vadd.f32 1e-12, %v2225_v11 }
0x198c   :  { %3291 = vrsqrt.f32 %v2228_v14 }
0x198d   :  { %3293 = vrsqrt.f32 %v2227_v17 }
0x1996   :  { %v3292_v19 = vpop.eup %3291 }
0x1997   :  { %v3294_v20 = vpop.eup %3293  ;;  %v2232_v21 = vmul.f32 %v3292_v19, %v2216_v58 }
0x1998   :  { %v2231_v22 = vmul.f32 %v3294_v20, %v2215_v1 }
0x1999   :  { %v2238_v27 = vmul.f32 %v2236_v18, %v2232_v21 }
0x199a   :  { %v2237_v29 = vmul.f32 %v2236_v18, %v2231_v22 }
0x199b   :  { %v2244_v31 = vadd.f32 %v2242_v23, %v2238_v27  ;;  %v2487_v27 = vld [vmem:[%s3978_s9] sm:$0xff] }
0x199c   :  { %v2243_v30 = vadd.f32 %v2242_v23, %v2237_v29  ;;  %v2488_v29 = vld [vmem:[%s3978_s9 + $0x8] sm:$0xff] }
0x199e   :  { %3070 = vmatprep.mubr.msk.f32.mxu1 %vm149_vm2, %v2243_v30 }
0x199f   :  { %3071 = vmatmul.mubr.msk.f32.vlgmr.msra.gmra.mrb[32].mxu1 %vm149_vm2, %v2244_v31 }
0x1a72   :  { %v3072_v41 = vpop.f32.mrb[32].mxu1 }
0x1a73   :  { %v2332_v42 = vadd.f32 %v3072_v41, %v2253_v40  ;;  %v2326_v43 = vpop.f32.mrb[33].mxu1  ;;  %v2484_v41 = vrot.slane %v3751_v4, %v1339_v53 }
0x1a74   :  { %v2327_v44 = vadd.f32 %v2326_v43, %v2253_v40 }
0x1a75   :  { %v2338_v45 = vmul.f32 0.044715, %v2332_v42  ;;  %v2336_v62 = vmul.f32 0.5, %v2332_v42 }
0x1a76   :  { %v2337_v46 = vmul.f32 0.044715, %v2327_v44  ;;  %v2335_v49 = vmul.f32 0.5, %v2327_v44 }
0x1a77   :  { %v2340_v47 = vmul.f32 %v2338_v45, %v2332_v42 }
0x1a78   :  { %v2339_v48 = vmul.f32 %v2337_v46, %v2327_v44 }
0x1a79   :  { %v2342_v50 = vmul.f32 %v2340_v47, %v2332_v42 }
0x1a7a   :  { %v2341_v60 = vmul.f32 %v2339_v48, %v2327_v44 }
0x1a7b   :  { %v2344_v51 = vadd.f32 %v2342_v50, %v2332_v42  ;;  %v2581_v50 = vld [vmem:[%s3971_s2 + $0x8] sm:$0xff] }
0x1a7c   :  { %v2343_v54 = vadd.f32 %v2341_v60, %v2327_v44  ;;  %v2580_v60 = vld [vmem:[%s3971_s2] sm:$0xff]  ;;  %vm2620_vm11 = vcmp.ne.s32.totalorder %v2581_v50, 4294967196  ;;  %s3371_s2 = smov [#allocation5]  }
0x1a7d   :  { %v2346_v55 = vmul.f32 0.7978846, %v2344_v51  ;;  %vm2619_vm12 = vcmp.ne.s32.totalorder %v2580_v60, 4294967196 }
0x1a7e   :  { %v2345_v56 = vmul.f32 0.7978846, %v2343_v54 }
0x1a7f   :  { %3295 = vtanh.f32 %v2346_v55 }
0x1a80   :  { %3297 = vtanh.f32 %v2345_v56 }
0x1a89   :  { %v3296_v57 = vpop.eup %3295 }
0x1a8a   :  { %v3298_v58 = vpop.eup %3297  ;;  %v2350_v1 = vadd.f32 1.0, %v3296_v57 }
0x1a8b   :  { %v2349_v59 = vadd.f32 1.0, %v3298_v58 }
0x1a8c   :  { %v2352_v3 = vmul.f32 %v2350_v1, %v2336_v62 }
0x1a8d   :  { %v2351_v0 = vmul.f32 %v2349_v59, %v2335_v49 }
0x1a8f   :  { %3089 = vmatprep.mubr.msk.f32.mxu0 %vm1221_vm7, %v2351_v0 }
0x1a90   :  { %3090 = vmatmul.mubr.msk.f32.vlgmr.msra.gmra.mrb[14].mxu0 %vm1221_vm7, %v2352_v3 }
0x1b63   :  { %v3091_v13 = vpop.f32.mrb[14].mxu0 }
0x1b64   :  { %v2444_v5 = vadd.f32 %v3091_v13, %v2365_v2  ;;  %v2438_v6 = vpop.f32.mrb[15].mxu0  ;;  %v2760_v13 = vsel %vm2620_vm11, 1.0, %v3363_v12 }
0x1b65   :  { %v2439_v7 = vadd.f32 %v2438_v6, %v2365_v2  ;;  %v2759_v2 = vsel %vm2619_vm12, 1.0, %v3363_v12  ;;  %v2644_v6 = vsel %vm2629_vm13, %v2760_v13, 0.0 }
0x1b66   :  { %v2448_v63 = vadd.f32 %v2444_v5, %v2244_v31  ;;  %v2489_v31 = vld [vmem:[%s3978_s9 + $0x10] sm:$0xff]  ;;  %v2643_v5 = vsel %vm2629_vm13, %v2759_v2, 0.0  ;;  %s2676_s9 = sshll.u32 %s3371_s2, 4  ;;  %s2677_s9 = int_to_ptr.vmem [resolvable:$true] %s2676_s9 }
0x1b67   :  { %v2447_v9 = vadd.f32 %v2439_v7, %v2243_v30  ;;  %v3215_v30 = vpack.c.bf16 %v2488_v29, %v2487_v27  ;;  %v3219_v32 = vpack.c.bf16 %v2490_v25, %v2489_v31  ;;  %v2645_v7 = vadd.f32 %v2644_v6, %v2643_v5  ;;  %s3313_s18 = scalar_lea.vmem %s2677_s9, 256  ;;  %p3318_p1 = scmp.lt.s32.totalorder %s2677_s9, %s2677_s9 }
0x1b68   :  { %v2452_v8 = vsel %vm149_vm2, %v2448_v63, 0.0  ;;  %p3314_p0 = scmp.ne.s32.totalorder %s2677_s9, %s3313_s18  ;;  %p3319_p2 = scmp.lt.s32.totalorder %s3313_s18, %s3313_s18 }
0x1b69   :  { %2453 = vadd.xlane.f32.xlu1 %v2452_v8  ;;  %v2449_v10 = vsel %vm149_vm2, %v2447_v9, 0.0  ;;  %3216 = vmatprep.subr.bf16.mxu1 %v3215_v30 }
0x1b6a   :  { %2450 = vadd.xlane.f32.xlu0 %v2449_v10  ;;  %3218 = vmatpush3.bf16.msra.mxu1 %v3215_v30  ;;  %p3320_p3 = por %p3319_p2, %p3318_p1 }
0x1b6b   :  { %3220 = vmatprep.subr.bf16.mxu1 %v3219_v32 }
0x1b6c   :  { %p3321_p4 = pnand %p3320_p3, %p3314_p0 }
0x1b6e   :  { %3222 = vmatpush3.bf16.msra.mxu1 %v3219_v32 }
0x1bf6   :  { %v2454_v11 = vpop.xlane.xlu1 %2453 }
0x1bf7   :  { %v2456_v14 = vmul.f32 0.03125, %v2454_v11  ;;  %v2451_v17 = vpop.xlane.xlu0 %2450 }
0x1bf8   :  { %v2455_v18 = vmul.f32 0.03125, %v2451_v17 }
0x1bf9   :  { %v2458_v19 = vsub.f32 %v2448_v63, %v2456_v14 }
0x1bfa   :  { %v2457_v20 = vsub.f32 %v2447_v9, %v2455_v18 }
0x1bfb   :  { %v2460_v21 = vmul.f32 %v2458_v19, %v2458_v19 }
0x1bfc   :  { %v2459_v15 = vmul.f32 %v2457_v20, %v2457_v20 }
0x1bfd   :  { %v2464_v22 = vsel %vm149_vm2, %v2460_v21, 0.0 }
0x1bfe   :  { %2465 = vadd.xlane.f32.xlu1 %v2464_v22  ;;  %v2461_v23 = vsel %vm149_vm2, %v2459_v15, 0.0 }
0x1bff   :  { %2462 = vadd.xlane.f32.xlu0 %v2461_v23 }
0x1c8b   :  { %v2466_v33 = vpop.xlane.xlu1 %2465 }
0x1c8c   :  { %v2468_v26 = vmul.f32 0.03125, %v2466_v33  ;;  %v2463_v34 = vpop.xlane.xlu0 %2462 }
0x1c8d   :  { %v2467_v36 = vmul.f32 0.03125, %v2463_v34 }
0x1c8e   :  { %v2470_v16 = vadd.f32 1e-12, %v2468_v26 }
0x1c8f   :  { %v2469_v38 = vadd.f32 1e-12, %v2467_v36 }
0x1c90   :  { %3299 = vrsqrt.f32 %v2470_v16 }
0x1c91   :  { %3301 = vrsqrt.f32 %v2469_v38 }
0x1c9a   :  { %v3300_v37 = vpop.eup %3299 }
0x1c9b   :  { %v3302_v35 = vpop.eup %3301  ;;  %v2474_v24 = vmul.f32 %v3300_v37, %v2458_v19 }
0x1c9c   :  { %v2473_v40 = vmul.f32 %v3302_v35, %v2457_v20 }
0x1c9d   :  { %v2480_v42 = vmul.f32 %v2478_v39, %v2474_v24 }
0x1c9e   :  { %v2479_v43 = vmul.f32 %v2478_v39, %v2473_v40 }
0x1c9f   :  { %v2486_v45 = vadd.f32 %v2484_v41, %v2480_v42 }
0x1ca0   :  { %v2485_v44 = vadd.f32 %v2484_v41, %v2479_v43 }
0x1ca2   :  { %3100 = vmatprep.mubr.msk.f32.mxu1 %vm149_vm2, %v2485_v44 }
0x1ca3   :  { %3101 = vmatmul.mubr.msk.f32.vlgmr.msra.gmra.mrb[34].mxu1 %vm149_vm2, %v2486_v45 }
0x1d76   :  { %v3102_v46 = vpop.f32.mrb[34].mxu1 }
0x1d77   :  { %v2574_v47 = vadd.f32 %v3102_v46, %v2756_v52  ;;  %v2568_v48 = vpop.f32.mrb[35].mxu1 }
0x1d78   :  { %v2569_v61 = vadd.f32 %v2756_v52, %v2568_v48 }
0x1d79   :  { %2579 = vst [vmem:[#allocation5 + $0x8] sm:$0xff] %v2574_v47  ;;  %v2584_v53 = vsel %vm2582_vm8, %v2574_v47, -1e+30 }
0x1d7a   :  { %2577 = vst [vmem:[#allocation5] sm:$0xff] %v2569_v61  ;;  %2587 = vmax.xlane.f32.xlu1 %v2584_v53  ;;  %v2583_v4 = vsel %vm2582_vm8, %v2569_v61, -1e+30 }
0x1d7b   :  { %2585 = vmax.xlane.f32.xlu0 %v2583_v4 }
0x1d8b   :  { %2609 = vperm.xlu1 %3242, %v2581_v50  }
0x1d91   :  { %2606 = vperm.xlu0 %3241, %v2580_v60  }
0x1e07   :  { %v2588_v51 = vpop.xlane.xlu1 %2587 }
0x1e08   :  { %v2590_v54 = vsub.f32 %v2584_v53, %v2588_v51  ;;  %v2586_v55 = vpop.xlane.xlu0 %2585 }
0x1e09   :  { %v2589_v56 = vsub.f32 %v2583_v4, %v2586_v55 }
0x1e0a   :  { %v2593_v57 = vmul.f32 1.442695, %v2590_v54 }
0x1e0b   :  { %v2591_v58 = vmul.f32 1.442695, %v2589_v56  ;;  %v2610_v49 = vpop.permute.xlu1 %2609 }
0x1e0c   :  { %3303 = vpow2.f32 %v2593_v57  ;;  %vm2612_vm10 = vcmp.eq.s32.totalorder %v3489_v28, %v2610_v49 }
0x1e0d   :  { %3305 = vpow2.f32 %v2591_v58  ;;  %v2614_v3 = vsel %vm2612_vm10, %v2574_v47, 0.0 }
0x1e10   :  { %v2607_v1 = vpop.permute.xlu0 %2606 }
0x1e11   :  { %vm2611_vm9 = vcmp.eq.s32.totalorder %v3489_v28, %v2607_v1 }
0x1e12   :  { %v2613_v0 = vsel %vm2611_vm9, %v2569_v61, 0.0 }
0x1e16   :  { %v3304_v59 = vpop.eup %3303 }
0x1e17   :  { %v3306_v62 = vpop.eup %3305  ;;  %2597 = vadd.xlane.f32.xlu0 %v3304_v59 }
0x1e18   :  { %2595 = vadd.xlane.f32.xlu1 %v3306_v62 }
0x1e1b   :  { %2615 = vadd.xlane.f32.xlu0 %v2613_v0 }
0x1e1c   :  { %2617 = vadd.xlane.f32.xlu1 %v2614_v3 }
0x1e20   :  { %2646 = vadd.xlane.f32.xlu1 %v2645_v7 }
0x1ea4   :  { %v2598_v63 = vpop.xlane.xlu0 %2597 }
0x1ea5   :  { %3307 = vlog2.f32 %v2598_v63  ;;  %v2596_v28 = vpop.xlane.xlu1 %2595 }
0x1ea6   :  { %3309 = vlog2.f32 %v2596_v28 }
0x1ea8   :  { %v2616_v19 = vpop.xlane.xlu0 %2615 }
0x1ea9   :  { %v2618_v18 = vpop.xlane.xlu1 %2617 }
0x1eaf   :  { %v3308_v9 = vpop.eup %3307 }
0x1eb0   :  { %v3310_v8 = vpop.eup %3309  ;;  %v2602_v10 = vmul.f32 0.6931472, %v3308_v9 }
0x1eb1   :  { %v2600_v11 = vmul.f32 0.6931472, %v3310_v8 }
0x1eb2   :  { %v2604_v14 = vadd.f32 %v2602_v10, %v2588_v51 }
0x1eb3   :  { %v2603_v17 = vadd.f32 %v2600_v11, %v2586_v55 }
0x1eb4   :  { %v2626_v12 = vsub.f32 %v2604_v14, %v2618_v18 }
0x1eb5   :  { %v2625_v20 = vsub.f32 %v2603_v17, %v2616_v19 }
0x1eb6   :  { %v2628_v21 = vmul.f32 %v2760_v13, %v2626_v12 }
0x1eb7   :  { %v2627_v15 = vmul.f32 %v2759_v2, %v2625_v20 }
0x1eb8   :  { %v2631_v22 = vsel %vm2629_vm13, %v2628_v21, 0.0 }
0x1eb9   :  { %v2630_v23 = vsel %vm2629_vm13, %v2627_v15, 0.0 }
0x1eba   :  { %v2632_v27 = vadd.f32 %v2631_v22, %v2630_v23 }
0x1ebc   :  { %2633 = vadd.xlane.f32.xlu0 %v2632_v27 }
0x1ebd   :  { %3324 = shalt.err (!%p3321_p4)
}
0x1ebe   :  { %s3325_s21 = scalar_lea.hbm %s3980_s11, 256 }
0x1ebf   :  { %p3326_p5 = scmp.ne.s32.totalorder %s3980_s11, %s3325_s21  ;;  %p3329_p6 = scmp.lt.u32.totalorder %s3325_s21, %s3980_s11 }
0x1ec1   :  { %p3331_p7 = pnand %p3329_p6, %p3326_p5 }
0x1ec3   :  { %3334 = shalt.err (!%p3331_p7)
}
0x1ec4   :  { %s3372_s28 = smov 128   ;;  %s3373_s29 = smov 8   ;;  %v2647_v29 = vpop.xlane.xlu1 %2646  ;;  %vm2659_vm14 = vcmask 0  }
0x1ec5   :  { %2682 = dma.vmem_to_hbm [thread:$0]  %s2677_s9, 256, %s3980_s11, [#allocation6], %s3372_s28, %s3372_s28, %s3373_s29   ;;  %v2648_v30 = vrot.slane %v2647_v29, 4 }
0x1ec6   :  { %s3374_s11 = smov [#allocation3]  }
0x1ec7   :  { %v2649_v31 = vadd.f32 %v2648_v30, %v2647_v29  ;;  %s2667_s24 = sshll.u32 %s3374_s11, 4  ;;  %s2668_s24 = int_to_ptr.vmem [resolvable:$true] %s2667_s24 }
0x1ec8   :  { %s3335_s25 = scalar_lea.vmem %s2668_s24, 16  ;;  %s3339_s5 = scalar_lea.vmem %s2668_s24, 32 }
0x1ec9   :  { %v2650_v25 = vrot.slane %v2649_v31, 2  ;;  %p3336_p8 = scmp.ne.s32.totalorder %s2668_s24, %s3335_s25  ;;  %p3340_p9 = scmp.lt.s32.totalorder %s2668_s24, %s2668_s24 }
0x1eca   :  { %p3341_p10 = scmp.lt.s32.totalorder %s3339_s5, %s3335_s25 }
0x1ecb   :  { %v2651_v34 = vadd.f32 %v2650_v25, %v2649_v31 }
0x1ecc   :  { %p3342_p11 = por %p3341_p10, %p3340_p9 }
0x1ecd   :  { %v2652_v38 = vrot.slane %v2651_v34, 1 }
0x1ece   :  { %p3343_p12 = pnand %p3342_p11, %p3336_p8 }
0x1ecf   :  { %v2653_v35 = vadd.f32 %v2652_v38, %v2651_v34 }
0x1f49   :  { %v2634_v32 = vpop.xlane.xlu0 %2633 }
0x1f4a   :  { %v2635_v33 = vrot.slane %v2634_v32, 4 }
0x1f4c   :  { %v2636_v26 = vadd.f32 %v2635_v33, %v2634_v32 }
0x1f4e   :  { %v2637_v36 = vrot.slane %v2636_v26, 2 }
0x1f50   :  { %v2638_v16 = vadd.f32 %v2637_v36, %v2636_v26 }
0x1f52   :  { %v2639_v39 = vrot.slane %v2638_v16, 1 }
0x1f54   :  { %v2640_v37 = vadd.f32 %v2639_v39, %v2638_v16 }
0x1f56   :  { %3223 = vpush %v2640_v37 }
0x1f57   :  { %3225 = vpush %v2653_v35 }
0x1f87   :  { %s3224_s14 = spop %3223 }
0x1f88   :  { %s3226_s7 = spop %3225  ;;  %v2642_v42 = vstv %s3224_s14 }
0x1f89   :  { %v2655_v24 = vstv %s3226_s7 }
0x1f8a   :  { %v2656_v40 = vmax.f32 %v2655_v24, 1.0 }
0x1f8c   :  { %3311 = vrcp.f32 %v2656_v40 }
0x1f96   :  { %v3312_v41 = vpop.eup %3311 }
0x1f97   :  { %v2658_v43 = vmul.f32 %v3312_v41, %v2642_v42 }
0x1f99   :  { %2660 = vst.msk [vmem:[#allocation3] sm:$0x1] %vm2659_vm14, %v2658_v43 }
0x1f9a   :  { %3346 = shalt.err (!%p3343_p12)
}
0x1f9b   :  { %s3347_s3 = scalar_lea.hbm %s3979_s10, 16 }
0x1f9c   :  { %p3348_p13 = scmp.ne.s32.totalorder %s3979_s10, %s3347_s3  ;;  %p3351_p0 = scmp.lt.u32.totalorder %s3347_s3, %s3979_s10 }
0x1f9e   :  { %p3353_p1 = pnand %p3351_p0, %p3348_p13 }
0x1fa0   :  { %3356 = shalt.err (!%p3353_p1)
}
0x1fa1   :  { %2670 = dma.vmem_to_hbm [thread:$0]  %s2668_s24, 16, %s3979_s10, [#allocation4]  }
0x1fa2   :  { %3357 = dma.done.wait [#allocation4], 16  }
0x1fa3   :  { %3358 = vsyncadd [#allocation4], 4294967280 }
0x1fa4   :  { %3359 = dma.done.wait [#allocation6], 256  }
0x1fa5   :  { %3360 = vsyncadd [#allocation6], 4294967040 }
0x1fa6   :  { %2689 = vsyncpa [#allocation4], 1 }
0x1fa7   :  { %2690 = vsyncpa [#allocation6], 1 }

</bundles_post_ra>
